<compile_context>
chip_gen: v5e
topology: v5e:2x2
jax: 0.10.0
libtpu: 0.0.40
codegen_flags: <defaults>
</compile_context>

<pallas_src>
import functools

import jax
import jax.numpy as jnp
from jax.experimental import pallas as pl
from jax.experimental.pallas import tpu as pltpu


# ----------------------------------------------------------------------------
# Model dimensions
# ----------------------------------------------------------------------------
C_STEM = 128          # synthetic stem width (lane-dense)
N_FEAT = 1000         # EfficientNet-b3 feature width (fixed by the spec)
N_FEAT_PAD = 1024     # padded to a multiple of 128 lanes
N_OUT = 26            # multi-label head width (fixed by the spec)
N_OUT_PAD = 128       # padded to one full lane register


# ----------------------------------------------------------------------------
# Fused Pallas kernel: conv(swish) -> GAP -> FC -> ReLU -> Linear -> sigmoid
# ----------------------------------------------------------------------------
def fused_forward_kernel(p_ref, cw_ref, cb_ref, fw_ref, fb_ref, ow_ref, ob_ref,
                         o_ref, acc_ref, *, inv_hw):
    """Grid = (batch, hw_tiles).

    p_ref : (TM, 9*Cin)      bf16   im2col row tile of the current image
    cw_ref: (9*Cin, C_STEM)  bf16   stem conv weight (resident)
    cb_ref: (1, C_STEM)      f32
    fw_ref: (C_STEM, 1024)   bf16   backbone FC (resident)
    fb_ref: (1, 1024)        f32
    ow_ref: (1024, 128)      bf16   output_layer (resident, zero-padded)
    ob_ref: (1, 128)         f32
    o_ref : (1, 128)         f32    sigmoid output for this image (padded lanes)
    acc_ref:(1, C_STEM)      f32    pooled-sum accumulator (VMEM scratch)
    """
    t = pl.program_id(1)

    @pl.when(t == 0)
    def _init():
        acc_ref[...] = jnp.zeros_like(acc_ref)

    # Stem conv as im2col matmul: bf16 inputs, f32 accumulate, fused bias + swish.
    conv = jnp.dot(p_ref[...], cw_ref[...], preferred_element_type=jnp.float32)
    conv = conv + cb_ref[...]
    act = conv * jax.nn.sigmoid(conv)                      # swish, f32 (TM, C_STEM)

    # Partial global-average-pool: row reduction on the MXU (ones-vector matmul),
    # accumulated in VMEM scratch instead of writing activations back to HBM.
    ones = jnp.full((1, act.shape[0]), 1.0, dtype=jnp.float32)
    acc_ref[...] += jnp.dot(ones, act, preferred_element_type=jnp.float32)

    # Head runs once per image, on the last row tile; feats never leave VMEM.
    @pl.when(t == pl.num_programs(1) - 1)
    def _finalize():
        pooled = acc_ref[...] * inv_hw                     # (1, C_STEM) f32
        feats = jnp.dot(pooled.astype(jnp.bfloat16), fw_ref[...],
                        preferred_element_type=jnp.float32) + fb_ref[...]
        x = jnp.maximum(feats, 0.0)                        # ReLU on 1000-d feats
        y = jnp.dot(x.astype(jnp.bfloat16), ow_ref[...],
                    preferred_element_type=jnp.float32) + ob_ref[...]
        o_ref[...] = jax.nn.sigmoid(y)                     # (1, N_OUT_PAD)


# ----------------------------------------------------------------------------
# Glue (plain JAX): im2col, parameter setup, pallas_call wiring
# ----------------------------------------------------------------------------
def im2col_3x3_same(x_nhwc):
    """Extract 3x3 'same' patches.  x: (N,H,W,C) -> (N, H*W, 9*C)."""
    n, h, w, c = x_nhwc.shape
    xp = jnp.pad(x_nhwc, ((0, 0), (1, 1), (1, 1), (0, 0)))
    patches = [xp[:, i:i + h, j:j + w, :] for i in range(3) for j in range(3)]
    return jnp.concatenate(patches, axis=-1).reshape(n, h * w, 9 * c)


def init_params(key, in_channels):
    k = jax.random.split(key, 6)
    scale = 0.05
    conv_w = scale * jax.random.normal(k[0], (9 * in_channels, C_STEM), jnp.float32)
    conv_b = scale * jax.random.normal(k[1], (1, C_STEM), jnp.float32)
    fc_w = scale * jax.random.normal(k[2], (C_STEM, N_FEAT), jnp.float32)
    fc_b = scale * jax.random.normal(k[3], (1, N_FEAT), jnp.float32)
    out_w = scale * jax.random.normal(k[4], (N_FEAT, N_OUT), jnp.float32)
    out_b = scale * jax.random.normal(k[5], (1, N_OUT), jnp.float32)

    # Zero-pad feature / output axes to lane-dense widths (math stays exact:
    # padded feats are 0, relu(0)=0, padded out_w rows/cols are 0).
    fc_w = jnp.pad(fc_w, ((0, 0), (0, N_FEAT_PAD - N_FEAT)))
    fc_b = jnp.pad(fc_b, ((0, 0), (0, N_FEAT_PAD - N_FEAT)))
    out_w = jnp.pad(out_w, ((0, N_FEAT_PAD - N_FEAT), (0, N_OUT_PAD - N_OUT)))
    out_b = jnp.pad(out_b, ((0, 0), (0, N_OUT_PAD - N_OUT)))

    return {
        "conv_w": conv_w.astype(jnp.bfloat16),   # (9*Cin, 128)
        "conv_b": conv_b,                        # (1, 128)   f32
        "fc_w": fc_w.astype(jnp.bfloat16),       # (128, 1024)
        "fc_b": fc_b,                            # (1, 1024)  f32
        "out_w": out_w.astype(jnp.bfloat16),     # (1024, 128)
        "out_b": out_b,                          # (1, 128)   f32
    }


def efficientnet_multilabel_forward(params, x_nchw):
    """Full forward pass.  Input x: (N, C, H, W) float32 (PyTorch convention)."""
    n, c, h, w = x_nchw.shape
    hw = h * w
    k9 = 9 * c

    x_nhwc = jnp.transpose(x_nchw, (0, 2, 3, 1))                  # NCHW -> NHWC
    patches = im2col_3x3_same(x_nhwc).astype(jnp.bfloat16)        # (N, HW, 9*C)

    # Row-tile of the im2col slab that streams through the pipeline.
    tm = min(hw, 512)
    assert hw % tm == 0, (hw, tm)
    n_tiles = hw // tm

    grid_spec = pltpu.PrefetchScalarGridSpec(
        num_scalar_prefetch=0,
        grid=(n, n_tiles),
        in_specs=[
            # streaming patch row-tiles (one image per batch grid step)
            pl.BlockSpec((None, tm, k9), lambda i, t: (i, t, 0)),
            # weights / biases: constant index_map -> fetched once, stay resident
            pl.BlockSpec((k9, C_STEM), lambda i, t: (0, 0)),
            pl.BlockSpec((1, C_STEM), lambda i, t: (0, 0)),
            pl.BlockSpec((C_STEM, N_FEAT_PAD), lambda i, t: (0, 0)),
            pl.BlockSpec((1, N_FEAT_PAD), lambda i, t: (0, 0)),
            pl.BlockSpec((N_FEAT_PAD, N_OUT_PAD), lambda i, t: (0, 0)),
            pl.BlockSpec((1, N_OUT_PAD), lambda i, t: (0, 0)),
        ],
        out_specs=pl.BlockSpec((None, 1, N_OUT_PAD), lambda i, t: (i, 0, 0)),
        scratch_shapes=[pltpu.VMEM((1, C_STEM), jnp.float32)],
    )

    out_padded = pl.pallas_call(
        functools.partial(fused_forward_kernel, inv_hw=1.0 / float(hw)),
        out_shape=jax.ShapeDtypeStruct((n, 1, N_OUT_PAD), jnp.float32),
        grid_spec=grid_spec,
        compiler_params=pltpu.CompilerParams(
            dimension_semantics=("parallel", "arbitrary"),
            vmem_limit_bytes=32 * 1024 * 1024,
        ),
    )(patches, params["conv_w"], params["conv_b"], params["fc_w"],
      params["fc_b"], params["out_w"], params["out_b"])

    return out_padded[:, 0, :N_OUT]                               # (N, 26)


# ----------------------------------------------------------------------------
# Main
# ----------------------------------------------------------------------------
if __name__ == "__main__":
    key = jax.random.PRNGKey(0)
    k_param, k_input = jax.random.split(key)

    N, C, H, W = 2, 4, 16, 16
    params = init_params(k_param, in_channels=C)
    x = jax.random.normal(k_input, (N, C, H, W), dtype=jnp.float32)

    fwd = jax.jit(efficientnet_multilabel_forward)
    out = fwd(params, x)
    jax.block_until_ready(out)

    assert out.shape == (N, 26), out.shape
    assert bool(jnp.all((out >= 0.0) & (out <= 1.0)))  # sigmoid range sanity check
    print("KERNEL_OK")
</pallas_src>

<mosaic_0001>
module attributes {stable_mosaic.version = 11 : i64} {
  func.func @fused_forward_kernel(%arg0: i32, %arg1: i32, %arg2: memref<1x256x36xbf16, #tpu.memory_space<vmem>>, %arg3: memref<36x128xbf16, #tpu.memory_space<vmem>>, %arg4: memref<1x128xf32, #tpu.memory_space<vmem>>, %arg5: memref<128x1024xbf16, #tpu.memory_space<vmem>>, %arg6: memref<1x1024xf32, #tpu.memory_space<vmem>>, %arg7: memref<1024x128xbf16, #tpu.memory_space<vmem>>, %arg8: memref<1x128xf32, #tpu.memory_space<vmem>>, %arg9: memref<1x1x128xf32, #tpu.memory_space<vmem>>, %arg10: memref<1x128xf32, #tpu.memory_space<vmem>>) attributes {dimension_semantics = [#tpu.dimension_semantics<parallel>, #tpu.dimension_semantics<arbitrary>], iteration_bounds = array<i64: 2, 1>, scalar_prefetch = 0 : i64, scratch_operands = 1 : i64, tpu.core_type = #tpu.core_type<tc>, window_params = [{transform_indices = @transform_0, window_bounds = array<i64: 1, 256, 36>}, {pipeline_mode = #tpu.pipeline_mode<synchronous>, transform_indices = @transform_1, window_bounds = array<i64: 36, 128>}, {pipeline_mode = #tpu.pipeline_mode<synchronous>, transform_indices = @transform_2, window_bounds = array<i64: 1, 128>}, {pipeline_mode = #tpu.pipeline_mode<synchronous>, transform_indices = @transform_3, window_bounds = array<i64: 128, 1024>}, {pipeline_mode = #tpu.pipeline_mode<synchronous>, transform_indices = @transform_4, window_bounds = array<i64: 1, 1024>}, {pipeline_mode = #tpu.pipeline_mode<synchronous>, transform_indices = @transform_5, window_bounds = array<i64: 1024, 128>}, {pipeline_mode = #tpu.pipeline_mode<synchronous>, transform_indices = @transform_6, window_bounds = array<i64: 1, 128>}, {transform_indices = @transform_7, window_bounds = array<i64: 1, 1, 128>}]} {
    %c0_i32 = arith.constant 0 : i32
    %0 = arith.cmpi eq, %arg1, %c0_i32 : i32
    %1 = arith.extui %0 : i1 to i32
    %c0_i32_0 = arith.constant 0 : i32
    %2 = arith.cmpi ne, %1, %c0_i32_0 : i32
    scf.if %2 {
      %cst_16 = arith.constant 0.000000e+00 : f32
      %24 = vector.broadcast %cst_16 : f32 to vector<1x128xf32>
      %c0_17 = arith.constant 0 : index
      %c0_18 = arith.constant 0 : index
      %25 = vector.load %arg10[%c0_17, %c0_18] : memref<1x128xf32, #tpu.memory_space<vmem>>, vector<1x128xf32>
      tpu.vector_store %arg10[%c0_17, %c0_18], %24 {strides = array<i32>} : memref<1x128xf32, #tpu.memory_space<vmem>>, vector<1x128xf32>,
    } else {
    }
    %c0 = arith.constant 0 : index
    %c0_1 = arith.constant 0 : index
    %c0_2 = arith.constant 0 : index
    %3 = vector.load %arg2[%c0, %c0_1, %c0_2] : memref<1x256x36xbf16, #tpu.memory_space<vmem>>, vector<1x256x36xbf16>
    %4 = vector.shape_cast %3 : vector<1x256x36xbf16> to vector<256x36xbf16>
    %c0_3 = arith.constant 0 : index
    %c0_4 = arith.constant 0 : index
    %5 = vector.load %arg3[%c0_3, %c0_4] : memref<36x128xbf16, #tpu.memory_space<vmem>>, vector<36x128xbf16>
    %cst = arith.constant dense<0.000000e+00> : vector<256x128xf32>
    %6 = tpu.matmul %4, %5, %cst {dimension_numbers = #tpu.dot_dimension_numbers<[1], [0], [0], [1], [0, 0, 1, 1], [], []>} : vector<256x36xbf16>, vector<36x128xbf16>, vector<256x128xf32> -> vector<256x128xf32>
    %c0_5 = arith.constant 0 : index
    %c0_6 = arith.constant 0 : index
    %7 = vector.load %arg4[%c0_5, %c0_6] : memref<1x128xf32, #tpu.memory_space<vmem>>, vector<1x128xf32>
    %8 = vector.broadcast %7 : vector<1x128xf32> to vector<256x128xf32>
    %9 = arith.addf %6, %8 : vector<256x128xf32>
    %10 = arith.negf %9 : vector<256x128xf32>
    %11 = math.exp %10 : vector<256x128xf32>
    %cst_7 = arith.constant 1.000000e+00 : f32
    %12 = vector.broadcast %cst_7 : f32 to vector<256x128xf32>
    %13 = arith.addf %12, %11 : vector<256x128xf32>
    %14 = arith.divf %12, %13 : vector<256x128xf32>
    %15 = arith.mulf %9, %14 : vector<256x128xf32>
    %cst_8 = arith.constant 1.000000e+00 : f32
    %16 = vector.broadcast %cst_8 : f32 to vector<1x256xf32>
    %c0_9 = arith.constant 0 : index
    %c0_10 = arith.constant 0 : index
    %17 = vector.load %arg10[%c0_9, %c0_10] : memref<1x128xf32, #tpu.memory_space<vmem>>, vector<1x128xf32>
    %cst_11 = arith.constant dense<0.000000e+00> : vector<1x128xf32>
    %18 = tpu.matmul %16, %15, %cst_11 {dimension_numbers = #tpu.dot_dimension_numbers<[1], [0], [0], [1], [0, 0, 1, 1], [], []>} : vector<1x256xf32>, vector<256x128xf32>, vector<1x128xf32> -> vector<1x128xf32>
    %19 = arith.addf %17, %18 : vector<1x128xf32>
    %c0_12 = arith.constant 0 : index
    %c0_13 = arith.constant 0 : index
    %20 = vector.load %arg10[%c0_12, %c0_13] : memref<1x128xf32, #tpu.memory_space<vmem>>, vector<1x128xf32>
    tpu.vector_store %arg10[%c0_12, %c0_13], %19 {strides = array<i32>} : memref<1x128xf32, #tpu.memory_space<vmem>>, vector<1x128xf32>,
    %c0_i32_14 = arith.constant 0 : i32
    %21 = arith.cmpi eq, %arg1, %c0_i32_14 : i32
    %22 = arith.extui %21 : i1 to i32
    %c0_i32_15 = arith.constant 0 : i32
    %23 = arith.cmpi ne, %22, %c0_i32_15 : i32
    scf.if %23 {
      %c0_16 = arith.constant 0 : index
      %c0_17 = arith.constant 0 : index
      %24 = vector.load %arg10[%c0_16, %c0_17] : memref<1x128xf32, #tpu.memory_space<vmem>>, vector<1x128xf32>
      %cst_18 = arith.constant 3.906250e-03 : f32
      %25 = vector.broadcast %cst_18 : f32 to vector<1x128xf32>
      %26 = arith.mulf %24, %25 : vector<1x128xf32>
      %27 = arith.truncf %26 : vector<1x128xf32> to vector<1x128xbf16>
      %c0_19 = arith.constant 0 : index
      %c0_20 = arith.constant 0 : index
      %28 = vector.load %arg5[%c0_19, %c0_20] : memref<128x1024xbf16, #tpu.memory_space<vmem>>, vector<128x1024xbf16>
      %cst_21 = arith.constant dense<0.000000e+00> : vector<1x1024xf32>
      %29 = tpu.matmul %27, %28, %cst_21 {dimension_numbers = #tpu.dot_dimension_numbers<[1], [0], [0], [1], [0, 0, 1, 1], [], []>} : vector<1x128xbf16>, vector<128x1024xbf16>, vector<1x1024xf32> -> vector<1x1024xf32>
      %c0_22 = arith.constant 0 : index
      %c0_23 = arith.constant 0 : index
      %30 = vector.load %arg6[%c0_22, %c0_23] : memref<1x1024xf32, #tpu.memory_space<vmem>>, vector<1x1024xf32>
      %31 = arith.addf %29, %30 : vector<1x1024xf32>
      %cst_24 = arith.constant 0.000000e+00 : f32
      %32 = vector.broadcast %cst_24 : f32 to vector<1x1024xf32>
      %33 = arith.maximumf %31, %32 : vector<1x1024xf32>
      %34 = arith.truncf %33 : vector<1x1024xf32> to vector<1x1024xbf16>
      %c0_25 = arith.constant 0 : index
      %c0_26 = arith.constant 0 : index
      %35 = vector.load %arg7[%c0_25, %c0_26] : memref<1024x128xbf16, #tpu.memory_space<vmem>>, vector<1024x128xbf16>
      %cst_27 = arith.constant dense<0.000000e+00> : vector<1x128xf32>
      %36 = tpu.matmul %34, %35, %cst_27 {dimension_numbers = #tpu.dot_dimension_numbers<[1], [0], [0], [1], [0, 0, 1, 1], [], []>} : vector<1x1024xbf16>, vector<1024x128xbf16>, vector<1x128xf32> -> vector<1x128xf32>
      %c0_28 = arith.constant 0 : index
      %c0_29 = arith.constant 0 : index
      %37 = vector.load %arg8[%c0_28, %c0_29] : memref<1x128xf32, #tpu.memory_space<vmem>>, vector<1x128xf32>
      %38 = arith.addf %36, %37 : vector<1x128xf32>
      %39 = arith.negf %38 : vector<1x128xf32>
      %40 = math.exp %39 : vector<1x128xf32>
      %cst_30 = arith.constant 1.000000e+00 : f32
      %41 = vector.broadcast %cst_30 : f32 to vector<1x128xf32>
      %42 = arith.addf %41, %40 : vector<1x128xf32>
      %43 = arith.divf %41, %42 : vector<1x128xf32>
      %c0_31 = arith.constant 0 : index
      %c0_32 = arith.constant 0 : index
      %c0_33 = arith.constant 0 : index
      %44 = vector.load %arg9[%c0_31, %c0_32, %c0_33] : memref<1x1x128xf32, #tpu.memory_space<vmem>>, vector<1x1x128xf32>
      %45 = vector.shape_cast %44 : vector<1x1x128xf32> to vector<1x128xf32>
      %46 = vector.shape_cast %43 : vector<1x128xf32> to vector<1x1x128xf32>
      tpu.vector_store %arg9[%c0_31, %c0_32, %c0_33], %46 {strides = array<i32>} : memref<1x1x128xf32, #tpu.memory_space<vmem>>, vector<1x1x128xf32>,
    } else {
    }
    return
  }
  func.func @transform_0(%arg0: i32, %arg1: i32) -> (i32, i32, i32) {
    %c0_i32 = arith.constant 0 : i32
    %c0_i32_0 = arith.constant 0 : i32
    return %arg0, %arg1, %c0_i32 : i32, i32, i32
  }
  func.func @transform_1(%arg0: i32, %arg1: i32) -> (i32, i32) {
    %c0_i32 = arith.constant 0 : i32
    %c0_i32_0 = arith.constant 0 : i32
    %c0_i32_1 = arith.constant 0 : i32
    return %c0_i32, %c0_i32_0 : i32, i32
  }
  func.func @transform_2(%arg0: i32, %arg1: i32) -> (i32, i32) {
    %c0_i32 = arith.constant 0 : i32
    %c0_i32_0 = arith.constant 0 : i32
    %c0_i32_1 = arith.constant 0 : i32
    return %c0_i32, %c0_i32_0 : i32, i32
  }
  func.func @transform_3(%arg0: i32, %arg1: i32) -> (i32, i32) {
    %c0_i32 = arith.constant 0 : i32
    %c0_i32_0 = arith.constant 0 : i32
    %c0_i32_1 = arith.constant 0 : i32
    return %c0_i32, %c0_i32_0 : i32, i32
  }
  func.func @transform_4(%arg0: i32, %arg1: i32) -> (i32, i32) {
    %c0_i32 = arith.constant 0 : i32
    %c0_i32_0 = arith.constant 0 : i32
    %c0_i32_1 = arith.constant 0 : i32
    return %c0_i32, %c0_i32_0 : i32, i32
  }
  func.func @transform_5(%arg0: i32, %arg1: i32) -> (i32, i32) {
    %c0_i32 = arith.constant 0 : i32
    %c0_i32_0 = arith.constant 0 : i32
    %c0_i32_1 = arith.constant 0 : i32
    return %c0_i32, %c0_i32_0 : i32, i32
  }
  func.func @transform_6(%arg0: i32, %arg1: i32) -> (i32, i32) {
    %c0_i32 = arith.constant 0 : i32
    %c0_i32_0 = arith.constant 0 : i32
    %c0_i32_1 = arith.constant 0 : i32
    return %c0_i32, %c0_i32_0 : i32, i32
  }
  func.func @transform_7(%arg0: i32, %arg1: i32) -> (i32, i32, i32) {
    %c0_i32 = arith.constant 0 : i32
    %c0_i32_0 = arith.constant 0 : i32
    %c0_i32_1 = arith.constant 0 : i32
    return %arg0, %c0_i32, %c0_i32_0 : i32, i32, i32
  }
}

</mosaic_0001>

<bundles_post_ra>
// kernel: efficientnet_multilabel_forward.1
= control target key start
LH: loop header
LB: loop body
LE: loop exit
PB: predicated region body
PF: predicated region fallthrough
CT: control target
= control target key end

     0   :  { %12 = vsyncpa [#allocation4], 0  ;;  %s5441_s0 = inlined_call_operand.vmem [shape: bf16[2,256,36], index: 0, kind: input, shape index: {}]   ;;  %s5442_s1 = inlined_call_operand.vmem [shape: bf16[36,128], index: 1, kind: input, shape index: {}]   ;;  %s5443_s2 = inlined_call_operand.vmem [shape: f32[1,128], index: 2, kind: input, shape index: {}]   ;;  %s5444_s3 = inlined_call_operand.vmem [shape: bf16[128,1024], index: 3, kind: input, shape index: {}]   ;;  %s5445_s4 = inlined_call_operand.vmem [shape: f32[1,1024], index: 4, kind: input, shape index: {}]   ;;  %s5446_s5 = inlined_call_operand.vmem [shape: bf16[1024,128], index: 5, kind: input, shape index: {}]   ;;  %s5447_s6 = inlined_call_operand.vmem [shape: f32[1,128], index: 6, kind: input, shape index: {}]   ;;  %s5448_s7 = inlined_call_operand.hbm [shape: f32[2,1,128], index: 7, kind: output, shape index: {}]  }
   0x1   :  { %14 = vsyncpa [#allocation4 + $0x1], 0  ;;  %s3626_s24 = smov 0   ;;  %s3628_s25 = smov 0  }
   0x2   :  { %s3630_s26 = smov 0   ;;  %s3632_s27 = smov 0  }
   0x3   :  { %s3634_s28 = smov 0   ;;  %s3636_s29 = smov 0  }
   0x4 LB: > { %s2518_s30 = sadd.s32 4294967295, %s3582_s29   ;;  %s2519_s8 = sadd.s32 4294967294, %s3582_s29   ;;  %s3582_s29 = sphi %s3636_s29, %s20_s29   ;;  %s3578_s28 = sphi %s3634_s28, %s5657_s28   ;;  %s3574_s27 = sphi %s3632_s27, %s5656_s27   ;;  %s3570_s26 = sphi %s3630_s26, %s5655_s26   ;;  %s3566_s25 = sphi %s3628_s25, %s5654_s25   ;;  %s3562_s24 = sphi %s3626_s24, %s5653_s24  }
   0x5   : > { %s32_s9 = sadd.s32 1, %s3578_s28  ;;  %s193_s10 = sadd.s32 1, %s3570_s26 }
   0x6   : > { %p34_p0 = scmp.ge.s32.totalorder %s32_s9, 2  ;;  %p203_p1 = scmp.ne.s32.totalorder %s3570_s26, %s3566_s25 }
   0x7   : > { %p204_p2 = scmp.eq.s32.totalorder %s2518_s30, 1  ;;  %p209_p3 = scmp.ne.s32.totalorder %s3566_s25, %s3562_s24 }
   0x8   : > { %s5659_s9 = smov (%p34_p0, %s32_s9), 0  ;;  %p210_p5 = scmp.eq.s32.totalorder %s2519_s8, 1 }
   0x9   : > { %p3666_p4 = por %p204_p2, %p203_p1  ;;  %s190_s12 = ssub.s32 %s3578_s28, %s5659_s9 }
   0xa   : > { %p2522_p6 = scmp.ge.s32.totalorder %s3582_s29, 1  ;;  %p191_p7 = scmp.eq.s32.totalorder %s190_s12, 0 }
   0xb   : > { %p3673_p8 = por %p210_p5, %p209_p3  ;;  %p259_p9 = scmp.lt.s32.totalorder %s3582_s29, 3 }
   0xc   : > { %s3679_s14 = scalar_select %p191_p7, %s3570_s26, %s193_s10  }
   0xd   : > { %p260_p10 = pnand %p2522_p6, %p259_p9 }
   0xf   : > { %263 = sbr.rel (%p260_p10) target bundleno = 899 (0x383), region = 48 }
  0x14   : > { %v346_v0 = vld [vmem:[%s5442_s1 + $0x10] sm:$0x3]  ;;  %p295_p11 = scmp.lt.s32.totalorder %s3574_s27, 1  ;;  %vm495_vm0 = vcmask 1041408   ;;  %v3178_v4 = vld [vmem:[%s5442_s1 + $0x8] sm:$0xff]  ;;  %v3177_v5 = vld [vmem:[%s5442_s1] sm:$0xff]  ;;  %s2445_s18 = scalar_lea.hbm %s5448_s7, %s3574_s27 }
  0x15   : > { %v440_v1 = vunpack.c.l.b16 %v346_v0  ;;  %vm446_vm1 = vcmask 293888   ;;  %v3730_v29 = vld [vmem:[%s5443_s2] ss:$0 sm:$0xff]  ;;  %s292_s15 = sand.u32 1, %s3566_s25   ;;  %s2449_s21 = sshll.u32 %s2445_s18, 4  ;;  %s2450_s21 = int_to_ptr.hbm [resolvable:$true] %s2449_s21 }
  0x16   : > { %s296_s17 = scalar_select %p295_p11, %s3574_s27, 1  ;;  %5485 = vst [vmem:[#allocation6_spill] sm:$0xff] %v3730_v29 }
  0x17   : > { %v443_v2 = vpack.c.b16 %v440_v1, %v440_v1  ;;  %s293_s19 = scalar_lea.vmem [#allocation3], %s292_s15  ;;  %s2437_s22 = scalar_lea.sflag [#allocation4], %s292_s15 }
  0x18   : > { %s3160_s20 = sshll.u32 %s296_s17, 7  ;;  %s3518_s27 = sshra.s32 %s2450_s21, 4  ;;  %s3519_s27 = int_to_ptr.hbm [resolvable:$true] %s3518_s27 }
  0x19   : > { %v497_v3 = vsel %vm495_vm0, %v443_v2, 0  ;;  %s3695_s8 = scalar_lea.vmem %s5441_s0, %s3160_s20  ;;  %s2447_s20 = sshll.u32 %s293_s19, 4  ;;  %s2448_s20 = int_to_ptr.vmem [resolvable:$true] %s2447_s20 }
  0x1a   : > { %504 = vmatpush.bf16.msra.mxu0 %v497_v3  ;;  %3307 = vmatpush.bf16.msra.mxu1 %v497_v3  ;;  %v3161_v6 = vld [vmem:[%s3695_s8] sm:$0xff]  ;;  %v3162_v7 = vld [vmem:[%s3695_s8 + $0x8] sm:$0xff]  ;;  %v3163_v8 = vld [vmem:[%s3695_s8 + $0x10] sm:$0xff]  ;;  %s3520_s23 = scalar_lea.hbm %s3519_s27, 1  ;;  %s3524_s10 = scalar_lea.hbm %s5448_s7, 2 }
  0x1b   : > { %3308 = vmatpush.bf16.msra.mxu2 %v497_v3  ;;  %v3164_v9 = vld [vmem:[%s3695_s8 + $0x18] sm:$0xff]  ;;  %v3165_v10 = vld [vmem:[%s3695_s8 + $0x20] sm:$0xff]  ;;  %v3174_v11 = vld [vmem:[%s3695_s8 + $0x68] sm:$0xff]  ;;  %p3521_p12 = scmp.ne.s32.totalorder %s3519_s27, %s3520_s23  ;;  %p3525_p1 = scmp.lt.s32.totalorder %s3519_s27, %s5448_s7 }
  0x1c   : > { %v3166_v12 = vld [vmem:[%s3695_s8 + $0x28] sm:$0xff]  ;;  %v3176_v13 = vld [vmem:[%s3695_s8 + $0x78] sm:$0xff]  ;;  %v3167_v14 = vld [vmem:[%s3695_s8 + $0x30] sm:$0xff]  ;;  %p3526_p2 = scmp.lt.s32.totalorder %s3524_s10, %s3520_s23 }
  0x1d   : > { %v3175_v15 = vld [vmem:[%s3695_s8 + $0x70] sm:$0xff]  ;;  %v3168_v16 = vld [vmem:[%s3695_s8 + $0x38] sm:$0xff]  ;;  %v3169_v17 = vld [vmem:[%s3695_s8 + $0x40] sm:$0xff]  ;;  %p3522_p13 = pnand %p3521_p12, %p3666_p4 }
  0x1e   : > { %505 = vmatpush.bf16.msra.mxu0 %v3178_v4  ;;  %3309 = vmatpush.bf16.msra.mxu1 %v3178_v4  ;;  %v3170_v20 = vld [vmem:[%s3695_s8 + $0x48] sm:$0xff]  ;;  %v3171_v23 = vld [vmem:[%s3695_s8 + $0x50] sm:$0xff]  ;;  %v3172_v26 = vld [vmem:[%s3695_s8 + $0x58] sm:$0xff]  ;;  %p3527_p3 = por %p3526_p2, %p3525_p1 }
  0x1f   : > { %3310 = vmatpush.bf16.msra.mxu2 %v3178_v4  ;;  %v3173_v32 = vld [vmem:[%s3695_s8 + $0x60] sm:$0xff]  ;;  %p3523_p0 = pneg %p3522_p13 }
  0x21   : > { %p3528_p5 = pnand %p3527_p3, %p3523_p0 }
  0x22   : > { %506 = vmatpush.bf16.msra.mxu0 %v3177_v5  ;;  %3311 = vmatpush.bf16.msra.mxu1 %v3177_v5 }
  0x23   : > { %3312 = vmatpush.bf16.msra.mxu2 %v3177_v5 }
  0x25   : > { %2597 = vmatmul.msk.bf16.vlgmr.msra.gmra.mxu0 %vm446_vm1, %v3161_v6  ;;  %2610 = vmatmul.msk.bf16.vlgmr.msra.gmra.mxu1 %vm446_vm1, %v3174_v11 }
  0x26   : > { %2612 = vmatmul.msk.bf16.vlgmr.msra.gmra.mxu2 %vm446_vm1, %v3176_v13 }
  0x35   : > { %2598 = vmatmul.msk.bf16.gmra.mxu0 %vm446_vm1, %v3162_v7  ;;  %2611 = vmatmul.msk.bf16.gmra.mxu1 %vm446_vm1, %v3175_v15 }
  0x45   : > { %2599 = vmatmul.msk.bf16.gmra.mxu0 %vm446_vm1, %v3163_v8 }
  0x55   : > { %2600 = vmatmul.msk.bf16.gmra.mxu0 %vm446_vm1, %v3164_v9 }
  0x65   : > { %2601 = vmatmul.msk.bf16.gmra.mxu0 %vm446_vm1, %v3165_v10 }
  0x75   : > { %2602 = vmatmul.msk.bf16.gmra.mxu0 %vm446_vm1, %v3166_v12 }
  0x85   : > { %2603 = vmatmul.msk.bf16.gmra.mxu0 %vm446_vm1, %v3167_v14 }
  0x95   : > { %2604 = vmatmul.msk.bf16.gmra.mxu0 %vm446_vm1, %v3168_v16 }
  0xa2   : > { %v508_v18 = vpop.f32.mrf.mxu0  ;;  %v573_v53 = vpop.f32.mrf.mxu1 }
  0xa3   : > { %v3733_v30 = vadd.f32 %v3730_v29, %v508_v18 }
  0xa5   : > { %2605 = vmatmul.msk.bf16.gmra.mxu0 %vm446_vm1, %v3169_v17  ;;  %5486 = vst [vmem:[#allocation7_spill] sm:$0xff] %v3733_v30  ;;  %v2613_v34 = vmul.f32 -1.442695, %v3733_v30 }
  0xa7   : > { %3371 = vpow2.f32 %v2613_v34  ;;  %v3833_v34 = vadd.f32 %v3730_v29, %v573_v53 }
  0xa9   : > { %v583_v13 = vpop.f32.mrf.mxu2  ;;  %5507 = vst [vmem:[#allocation28_spill] sm:$0xff] %v3833_v34 }
  0xaa   : > { %v510_v19 = vpop.f32.mrf.mxu0  ;;  %v575_v5 = vpop.f32.mrf.mxu1 }
  0xab   : > { %v3736_v31 = vadd.f32 %v3730_v29, %v510_v19 }
  0xad   : > { %5487 = vst [vmem:[#allocation8_spill] sm:$0xff] %v3736_v31  ;;  %v2614_v35 = vmul.f32 -1.442695, %v3736_v31  ;;  %v3372_v46 = vpop.eup %3371 }
  0xae   : > { %v3768_v51 = vadd.f32 1.0, %v3372_v46 }
  0xaf   : > { %3373 = vpow2.f32 %v2614_v35 }
  0xb0   : > { %5495 = vst [vmem:[#allocation16_spill] sm:$0xff] %v3768_v51 }
  0xb1   : > { %v585_v35 = vpop.f32.mrf.mxu2 }
  0xb2   : > { %v513_v21 = vpop.f32.mrf.mxu0  ;;  %v3841_v46 = vadd.f32 %v3730_v29, %v585_v35 }
  0xb3   : > { %v3742_v36 = vadd.f32 %v3730_v29, %v513_v21  ;;  %v578_v21 = vpop.f32.mrf.mxu1 }
  0xb5   : > { %2606 = vmatmul.msk.bf16.gmra.mxu0 %vm446_vm1, %v3170_v20  ;;  %5488 = vst [vmem:[#allocation9_spill] sm:$0xff] %v3742_v36  ;;  %v2615_v40 = vmul.f32 -1.442695, %v3742_v36  ;;  %v3374_v48 = vpop.eup %3373 }
  0xb6   : > { %v3773_v54 = vadd.f32 1.0, %v3374_v48 }
  0xb7   : > { %3375 = vpow2.f32 %v2615_v40 }
  0xb8   : > { %5497 = vst [vmem:[#allocation18_spill] sm:$0xff] %v3773_v54 }
  0xba   : > { %v515_v22 = vpop.f32.mrf.mxu0 }
  0xbb   : > { %v3745_v37 = vadd.f32 %v3730_v29, %v515_v22 }
  0xbd   : > { %5489 = vst [vmem:[#allocation10_spill] sm:$0xff] %v3745_v37  ;;  %v2616_v41 = vmul.f32 -1.442695, %v3745_v37  ;;  %v3376_v55 = vpop.eup %3375 }
  0xbe   : > { %v3780_v63 = vadd.f32 1.0, %v3376_v55 }
  0xbf   : > { %3377 = vpow2.f32 %v2616_v41 }
  0xc0   : > { %5498 = vst [vmem:[#allocation19_spill] sm:$0xff] %v3780_v63 }
  0xc2   : > { %v518_v24 = vpop.f32.mrf.mxu0 }
  0xc3   : > { %v3749_v38 = vadd.f32 %v3730_v29, %v518_v24 }
  0xc5   : > { %2607 = vmatmul.msk.bf16.gmra.mxu0 %vm446_vm1, %v3171_v23  ;;  %5490 = vst [vmem:[#allocation11_spill] sm:$0xff] %v3749_v38  ;;  %v2617_v43 = vmul.f32 -1.442695, %v3749_v38  ;;  %v3378_v58 = vpop.eup %3377 }
  0xc6   : > { %v3785_v1 = vadd.f32 1.0, %v3378_v58  ;;  %v2644_v58 = vmul.f32 -1.442695, %v3841_v46 }
  0xc7   : > { %3379 = vpow2.f32 %v2617_v43 }
  0xc8   : > { %5500 = vst [vmem:[#allocation21_spill] sm:$0xff] %v3785_v1 }
  0xca   : > { %v520_v25 = vpop.f32.mrf.mxu0 }
  0xcb   : > { %v3752_v39 = vadd.f32 %v3730_v29, %v520_v25 }
  0xcd   : > { %5491 = vst [vmem:[#allocation12_spill] sm:$0xff] %v3752_v39  ;;  %v2618_v45 = vmul.f32 -1.442695, %v3752_v39  ;;  %v3380_v60 = vpop.eup %3379 }
  0xce   : > { %v3787_v3 = vadd.f32 1.0, %v3380_v60  ;;  %v580_v60 = vpop.f32.mrf.mxu1 }
  0xcf   : > { %3381 = vpow2.f32 %v2618_v45  ;;  %v3838_v45 = vadd.f32 %v3730_v29, %v575_v5 }
  0xd0   : > { %5501 = vst [vmem:[#allocation22_spill] sm:$0xff] %v3787_v3 }
  0xd1   : > { %v2640_v5 = vmul.f32 -1.442695, %v3838_v45 }
  0xd2   : > { %v523_v27 = vpop.f32.mrf.mxu0 }
  0xd3   : > { %v3763_v49 = vadd.f32 %v3730_v29, %v523_v27 }
  0xd5   : > { %2608 = vmatmul.msk.bf16.gmra.mxu0 %vm446_vm1, %v3172_v26  ;;  %5493 = vst [vmem:[#allocation14_spill] sm:$0xff] %v3763_v49  ;;  %v2619_v56 = vmul.f32 -1.442695, %v3763_v49  ;;  %v3382_v62 = vpop.eup %3381 }
  0xd6   : > { %v3789_v4 = vadd.f32 1.0, %v3382_v62 }
  0xda   : > { %v525_v28 = vpop.f32.mrf.mxu0 }
  0xdb   : > { %v3757_v42 = vadd.f32 %v3730_v29, %v525_v28 }
  0xdd   : > { %5492 = vst [vmem:[#allocation13_spill] sm:$0xff] %v3757_v42  ;;  %v2620_v47 = vmul.f32 -1.442695, %v3757_v42 }
  0xdf   : > { %3383 = vpow2.f32 %v2620_v47 }
  0xe0   : > { %3385 = vrcp.f32 %v3768_v51 }
  0xe1   : > { %3387 = vrcp.f32 %v3773_v54 }
  0xe2   : > { %v528_v33 = vpop.f32.mrf.mxu0  ;;  %3389 = vpow2.f32 %v2619_v56 }
  0xe3   : > { %v3766_v50 = vadd.f32 %v3730_v29, %v528_v33 }
  0xe5   : > { %2609 = vmatmul.msk.bf16.gmra.mxu0 %vm446_vm1, %v3173_v32  ;;  %5494 = vst [vmem:[#allocation15_spill] sm:$0xff] %v3766_v50  ;;  %v2621_v59 = vmul.f32 -1.442695, %v3766_v50  ;;  %v3384_v2 = vpop.eup %3383 }
  0xe6   : > { %v3793_v7 = vpop.eup %3385  ;;  %v3796_v8 = vadd.f32 1.0, %v3384_v2 }
  0xe7   : > { %3391 = vpow2.f32 %v2621_v59  ;;  %5502 = vst [vmem:[#allocation23_spill] sm:$0xff] %v3793_v7  ;;  %v3798_v10 = vpop.eup %3387  ;;  %v717_v23 = vmul.f32 %v3793_v7, %v3768_v51  ;;  %v2639_v59 = vmul.f32 -1.442695, %v3833_v34 }
  0xe8   : > { %5503 = vst [vmem:[#allocation24_spill] sm:$0xff] %v3798_v10  ;;  %v3390_v12 = vpop.eup %3389  ;;  %v732_v22 = vmul.f32 %v3798_v10, %v3773_v54 }
  0xe9   : > { %v3809_v18 = vadd.f32 1.0, %v3390_v12  ;;  %v718_v41 = vsub.f32 1.0, %v717_v23 }
  0xea   : > { %v530_v44 = vpop.f32.mrf.mxu0  ;;  %v733_v40 = vsub.f32 1.0, %v732_v22 }
  0xeb   : > { %v3771_v52 = vadd.f32 %v3730_v29, %v530_v44 }
  0xed   : > { %5496 = vst [vmem:[#allocation17_spill] sm:$0xff] %v3771_v52  ;;  %v2622_v61 = vmul.f32 -1.442695, %v3771_v52  ;;  %v3392_v14 = vpop.eup %3391 }
  0xee   : > { %v3813_v20 = vadd.f32 1.0, %v3392_v14 }
  0xef   : > { %3393 = vpow2.f32 %v2622_v61 }
  0xf0   : > { %3395 = vrcp.f32 %v3780_v63 }
  0xf1   : > { %3397 = vrcp.f32 %v3785_v1 }
  0xf2   : > { %v533_v57 = vpop.f32.mrf.mxu0  ;;  %3399 = vrcp.f32 %v3787_v3 }
  0xf3   : > { %v3783_v0 = vadd.f32 %v3730_v29, %v533_v57  ;;  %3401 = vrcp.f32 %v3789_v4  ;;  %v3854_v57 = vadd.f32 %v3730_v29, %v583_v13 }
  0xf5   : > { %5499 = vst [vmem:[#allocation20_spill] sm:$0xff] %v3783_v0  ;;  %v2623_v6 = vmul.f32 -1.442695, %v3783_v0  ;;  %v3394_v16 = vpop.eup %3393  ;;  %v2643_v14 = vmul.f32 -1.442695, %v3854_v57 }
  0xf6   : > { %v3807_v17 = vpop.eup %3395  ;;  %v3821_v25 = vadd.f32 1.0, %v3394_v16  ;;  %v3876_v16 = vmul.f32 %v3798_v10, %v733_v40 }
  0xf7   : > { %3403 = vpow2.f32 %v2623_v6  ;;  %5505 = vst [vmem:[#allocation26_spill] sm:$0xff] %v3807_v17  ;;  %v3811_v19 = vpop.eup %3397  ;;  %v747_v55 = vmul.f32 %v3807_v17, %v3780_v63  ;;  %v3866_v6 = vadd.f32 %v3730_v29, %v580_v60 }
  0xf8   : > { %3405 = vrcp.f32 %v3796_v8  ;;  %5506 = vst [vmem:[#allocation27_spill] sm:$0xff] %v3811_v19  ;;  %v3819_v24 = vpop.eup %3399  ;;  %v762_v53 = vmul.f32 %v3811_v19, %v3785_v1 }
  0xf9   : > { %v3823_v26 = vpop.eup %3401  ;;  %v777_v48 = vmul.f32 %v3819_v24, %v3787_v3  ;;  %5509 = vst [vmem:[#allocation30_spill] sm:$0xff] %v3876_v16  ;;  %v2642_v40 = vmul.f32 -1.442695, %v3866_v6 }
  0xfa   : > { %v535_v9 = vpop.f32.mrf.mxu0  ;;  %v792_v62 = vmul.f32 %v3823_v26, %v3789_v4 }
  0xfb   : > { %v3802_v11 = vadd.f32 %v3730_v29, %v535_v9  ;;  %v3869_v9 = vmul.f32 %v3793_v7, %v718_v41 }
  0xfd   : > { %5504 = vst [vmem:[#allocation25_spill] sm:$0xff] %v3802_v11  ;;  %v2624_v15 = vmul.f32 -1.442695, %v3802_v11  ;;  %v3404_v28 = vpop.eup %3403 }
  0xfe   : > { %v3829_v33 = vpop.eup %3405  ;;  %v3843_v47 = vadd.f32 1.0, %v3404_v28  ;;  %5508 = vst [vmem:[#allocation29_spill] sm:$0xff] %v3869_v9  ;;  %v763_v28 = vsub.f32 1.0, %v762_v53 }
  0xff   : > { %3407 = vpow2.f32 %v2624_v15  ;;  %v822_v61 = vmul.f32 %v3829_v33, %v3796_v8  ;;  %v748_v15 = vsub.f32 1.0, %v747_v55 }
 0x100   : > { %3409 = vrcp.f32 %v3809_v18 }
 0x101   : > { %3411 = vrcp.f32 %v3813_v20  ;;  %v823_v35 = vsub.f32 1.0, %v822_v61 }
 0x102   : > { %v538_v27 = vpop.f32.mrf.mxu0  ;;  %3413 = vrcp.f32 %v3821_v25 }
 0x103   : > { %v3827_v32 = vadd.f32 %v3730_v29, %v538_v27  ;;  %v778_v27 = vsub.f32 1.0, %v777_v48  ;;  %v3893_v48 = vadd.f32 %v3730_v29, %v578_v21 }
 0x105   : > { %v3408_v43 = vpop.eup %3407  ;;  %v2625_v44 = vmul.f32 -1.442695, %v3827_v32  ;;  %v2641_v36 = vmul.f32 -1.442695, %v3893_v48 }
 0x106   : > { %v3851_v56 = vadd.f32 1.0, %v3408_v43  ;;  %v3862_v2 = vpop.eup %3409  ;;  %v793_v43 = vsub.f32 1.0, %v792_v62  ;;  %v3899_v62 = vmul.f32 %v3811_v19, %v763_v28  ;;  %v824_v28 = vmul.f32 %v3829_v33, %v823_v35 }
 0x107   : > { %3415 = vpow2.f32 %v2625_v44  ;;  %v3871_v12 = vpop.eup %3411  ;;  %v807_v41 = vmul.f32 %v3862_v2, %v3809_v18 }
 0x108   : > { %3417 = vpow2.f32 %v2644_v58  ;;  %v3878_v22 = vpop.eup %3413  ;;  %v837_v58 = vmul.f32 %v3871_v12, %v3813_v20  ;;  %5510 = vst [vmem:[#allocation31_spill] sm:$0xff] %v3899_v62  ;;  %vm886_vm2 = vweird.f32 %v3851_v56 }
 0x109   : > { %3419 = vrcp.f32 %v3843_v47  ;;  %v852_v53 = vmul.f32 %v3878_v22, %v3821_v25  ;;  %v808_v21 = vsub.f32 1.0, %v807_v41  ;;  %v3919_v41 = vmul.f32 %v3823_v26, %v793_v43 }
 0x10a   : > { %v540_v13 = vpop.f32.mrf.mxu0  ;;  %3421 = vrcp.f32 %v3851_v56 }
 0x10b   : > { %v3882_v23 = vadd.f32 %v3730_v29, %v540_v13  ;;  %3423 = vpow2.f32 %v2639_v59  ;;  %v853_v37 = vsub.f32 1.0, %v852_v53  ;;  %5513 = vst [vmem:[#allocation34_spill] sm:$0xff] %v3919_v41 }
 0x10c   : > { %3425 = vpow2.f32 %v2640_v5  ;;  %v3902_v5 = vmul.f32 %v3807_v17, %v748_v15 }
 0x10d   : > { %v3416_v44 = vpop.eup %3415  ;;  %v2626_v55 = vmul.f32 -1.442695, %v3882_v23  ;;  %3427 = vpow2.f32 %v2643_v14 }
 0x10e   : > { %v3890_v60 = vadd.f32 1.0, %v3416_v44  ;;  %v3418_v59 = vpop.eup %3417  ;;  %5511 = vst [vmem:[#allocation32_spill] sm:$0xff] %v3902_v5  ;;  %v3910_v44 = vmul.f32 %v3819_v24, %v778_v27 }
 0x10f   : > { %3429 = vpow2.f32 %v2626_v55  ;;  %v3904_v13 = vpop.eup %3419  ;;  %v3907_v14 = vadd.f32 1.0, %v3418_v59  ;;  %v838_v55 = vsub.f32 1.0, %v837_v58  ;;  %v3933_v59 = vmul.f32 %v3862_v2, %v808_v21 }
 0x110   : > { %3431 = vrcp.f32 %v3890_v60  ;;  %5512 = vst [vmem:[#allocation33_spill] sm:$0xff] %v3910_v44  ;;  %v3912_v30 = vpop.eup %3421  ;;  %v867_v35 = vmul.f32 %v3904_v13, %v3843_v47  ;;  %v854_v21 = vmul.f32 %v3878_v22, %v853_v37  ;;  %v892_v37 = vand.u32 2147483648, %v3851_v56 }
 0x111   : > { %3433 = vpow2.f32 %v2642_v40  ;;  %v3424_v15 = vpop.eup %3423  ;;  %v882_v53 = vmul.f32 %v3912_v30, %v3851_v56  ;;  %5514 = vst [vmem:[#allocation35_spill] sm:$0xff] %v3933_v59  ;;  %v839_v9 = vmul.f32 %v3871_v12, %v838_v55  ;;  %v3939_v40 = vadd.f32 %v3829_v33, %v824_v28 }
 0x112   : > { %v543_v31 = vpop.f32.mrf.mxu0  ;;  %v3426_v27 = vpop.eup %3425  ;;  %3435 = vrcp.f32 %v3907_v14  ;;  %v3945_v61 = vadd.f32 1.0, %v3424_v15  ;;  %v868_v39 = vsub.f32 1.0, %v867_v35  ;;  %v3969_v42 = vadd.f32 %v3878_v22, %v854_v21 }
 0x113   : > { %v3922_v38 = vadd.f32 %v3730_v29, %v543_v31  ;;  %v3428_v58 = vpop.eup %3427  ;;  %5515 = vst [vmem:[#allocation36_spill] sm:$0xff] %v3939_v40  ;;  %3437 = vpow2.f32 %v2641_v36  ;;  %v883_v28 = vsub.f32 1.0, %v882_v53  ;;  %v3957_v36 = vadd.f32 1.0, %v3426_v27 }
 0x114   : > { %v3948_v5 = vadd.f32 1.0, %v3428_v58  ;;  %v3962_v58 = vadd.f32 %v3871_v12, %v839_v9  ;;  %vm887_vm3 = vweird.f32 %v3912_v30  ;;  %vm901_vm4 = vweird.f32 %v3890_v60 }
 0x115   : > { %v3430_v31 = vpop.eup %3429  ;;  %v2627_v51 = vmul.f32 -1.442695, %v3922_v38  ;;  %v884_v50 = vmul.f32 %v3912_v30, %v883_v28  ;;  %v907_v28 = vand.u32 2147483648, %v3890_v60  ;;  %vm1186_vm7 = vweird.f32 %v3907_v14  ;;  %vm4026_vm8 = vmor %vm886_vm2, %vm887_vm3 }
 0x116   : > { %v3941_v16 = vpop.eup %3431  ;;  %v3943_v49 = vadd.f32 1.0, %v3430_v31  ;;  %5516 = vst [vmem:[#allocation37_spill] sm:$0xff] %v3962_v58  ;;  %vm1171_vm0 = vweird.f32 %v3948_v5 }
 0x117   : > { %v3434_v43 = vpop.eup %3433  ;;  %3439 = vpow2.f32 %v2627_v51  ;;  %v897_v55 = vmul.f32 %v3941_v16, %v3890_v60  ;;  %v869_v51 = vmul.f32 %v3904_v13, %v868_v39  ;;  %v4004_v34 = vadd.f32 %v3912_v30, %v884_v50 }
 0x118   : > { %3441 = vrcp.f32 %v3943_v49  ;;  %v3955_v15 = vpop.eup %3435  ;;  %v3965_v62 = vadd.f32 1.0, %v3434_v43  ;;  %vm902_vm5 = vweird.f32 %v3941_v16  ;;  %v908_v50 = vor.u32 1.1754944e-38, %v907_v28 }
 0x119   : > { %3443 = vrcp.f32 %v3945_v61  ;;  %v898_v31 = vsub.f32 1.0, %v897_v55  ;;  %v3438_v9 = vpop.eup %3437  ;;  %v1182_v53 = vmul.f32 %v3955_v15, %v3907_v14  ;;  %v3984_v55 = vor.u32 1.1754944e-38, %v892_v37  ;;  %vm4058_vm12 = vmor %vm901_vm4, %vm902_vm5 }
 0x11a   : > { %v545_v35 = vpop.f32.mrf.mxu0  ;;  %3445 = vrcp.f32 %v3948_v5  ;;  %v3996_v52 = vadd.f32 %v3904_v13, %v869_v51  ;;  %v1192_v51 = vand.u32 2147483648, %v3907_v14  ;;  %vm1187_vm9 = vweird.f32 %v3955_v15 }
 0x11b   : > { %v3972_v27 = vadd.f32 %v3730_v29, %v545_v35  ;;  %3447 = vrcp.f32 %v3957_v36  ;;  %v905_v29 = vand.u32 2147483647, %v3890_v60  ;;  %v1183_v43 = vsub.f32 1.0, %v1182_v53  ;;  %vm4039_vm10 = vmor %vm1186_vm7, %vm1187_vm9 }
 0x11c   : > { %3449 = vrcp.f32 %v3965_v62  ;;  %v899_v44 = vmul.f32 %v3941_v16, %v898_v31  ;;  %v1190_v28 = vand.u32 2147483647, %v3907_v14  ;;  %vm916_vm11 = vweird.f32 %v3943_v49 }
 0x11d   : > { %v3440_v21 = vpop.eup %3439  ;;  %v2628_v35 = vmul.f32 -1.442695, %v3972_v27  ;;  %v1184_v31 = vmul.f32 %v3955_v15, %v1183_v43  ;;  %vm4016_vm6 = vcmp.eq.f32.partialorder %v905_v29, 8.507059e+37  ;;  %v920_v17 = vand.u32 2147483647, %v3943_v49 }
 0x11e   : > { %v3986_v39 = vpop.eup %3441  ;;  %v3988_v7 = vadd.f32 1.0, %v3440_v21  ;;  %v4001_v21 = vadd.f32 1.0, %v3438_v9  ;;  %v900_v0 = vadd.f32 %v3941_v16, %v899_v44  ;;  %v1193_v59 = vor.u32 1.1754944e-38, %v1192_v51 }
 0x11f   : > { %3451 = vpow2.f32 %v2628_v35  ;;  %v912_v54 = vmul.f32 %v3986_v39, %v3943_v49  ;;  %v3998_v37 = vpop.eup %3443  ;;  %v922_v35 = vand.u32 2147483648, %v3943_v49  ;;  %vm1191_vm13 = vcmp.eq.f32.partialorder %v1190_v28, 8.507059e+37 }
 0x120   : > { %3453 = vrcp.f32 %v3988_v7  ;;  %v4007_v53 = vpop.eup %3445  ;;  %vm917_vm14 = vweird.f32 %v3986_v39  ;;  %v904_v60 = vsel %vm4058_vm12, %v3941_v16, %v900_v0  ;;  %vm931_vm15 = vweird.f32 %v3988_v7 }
 0x121   : > { %v4021_v63 = vpop.eup %3447  ;;  %v913_v40 = vsub.f32 1.0, %v912_v54  ;;  %3455 = vrcp.f32 %v4001_v21  ;;  %v4048_v1 = vor.u32 1.1754944e-38, %v922_v35  ;;  %v1177_v44 = vand.u32 2147483648, %v3948_v5  ;;  %vm4118_vm9 = vmor %vm916_vm11, %vm917_vm14 }
 0x122   : > { %v4013_v10 = vpop.f32.mrf.mxu0  ;;  %v4032_v29 = vpop.eup %3449  ;;  %v935_v0 = vand.u32 2147483647, %v3988_v7  ;;  %v937_v16 = vand.u32 2147483648, %v3988_v7  ;;  %v4087_v14 = vsel %vm4016_vm6, %v908_v50, %v904_v60  ;;  %vm1172_vm1 = vweird.f32 %v4007_v53  ;;  %v5577_v60 = vld [vmem:[#allocation35_spill] sm:$0xff] }
 0x123   : > { %5517 = vst [vmem:[#allocation38_spill] sm:$0xff] %v4013_v10  ;;  %v1185_v10 = vadd.f32 %v3955_v15, %v1184_v31  ;;  %v1167_v31 = vmul.f32 %v4007_v53, %v3948_v5  ;;  %vm4094_vm2 = vcmp.eq.f32.partialorder %v920_v17, 8.507059e+37  ;;  %vm4098_vm3 = vmor %vm1171_vm0, %vm1172_vm1  ;;  %v1175_v9 = vand.u32 2147483647, %v3948_v5 }
 0x124   : > { %vm1156_vm4 = vweird.f32 %v3965_v62  ;;  %vm1157_vm6 = vweird.f32 %v4032_v29  ;;  %vm4110_vm7 = vcmp.eq.f32.partialorder %v935_v0, 8.507059e+37  ;;  %vm872_vm0 = vweird.f32 %v3904_v13 }
 0x125   : > { %v3452_v41 = vpop.eup %3451  ;;  %v1189_v11 = vsel %vm4039_vm10, %v3955_v15, %v1185_v10  ;;  %v1168_v35 = vsub.f32 1.0, %v1167_v31  ;;  %v1152_v10 = vmul.f32 %v4032_v29, %v3965_v62  ;;  %vm1176_vm10 = vcmp.eq.f32.partialorder %v1175_v9, 8.507059e+37  ;;  %vm4131_vm11 = vmor %vm1156_vm4, %vm1157_vm6 }
 0x126   : > { %v4050_v58 = vpop.eup %3453  ;;  %v4052_v54 = vadd.f32 1.0, %v3452_v41  ;;  %v914_v41 = vmul.f32 %v3986_v39, %v913_v40  ;;  %v1194_v28 = vsel %vm1191_vm13, %v1193_v59, %v1189_v11  ;;  %vm871_vm1 = vweird.f32 %v3843_v47 }
 0x127   : > { %v927_v51 = vmul.f32 %v4050_v58, %v3988_v7  ;;  %v1169_v31 = vmul.f32 %v4007_v53, %v1168_v35  ;;  %v4079_v40 = vpop.eup %3455  ;;  %v1227_v3 = vmul.f32 %v1194_v28, %v3841_v46  ;;  %v1178_v46 = vor.u32 1.1754944e-38, %v1177_v44 }
 0x128   : > { %3457 = vrcp.f32 %v4052_v54  ;;  %v915_v59 = vadd.f32 %v3986_v39, %v914_v41  ;;  %v1153_v50 = vsub.f32 1.0, %v1152_v10  ;;  %vm932_vm5 = vweird.f32 %v4050_v58 }
 0x129   : > { %v928_v15 = vsub.f32 1.0, %v927_v51  ;;  %v1170_v35 = vadd.f32 %v4007_v53, %v1169_v31  ;;  %1249 = vmatpush.msrb.mxu2 %v1227_v3  ;;  %vm946_vm12 = vweird.f32 %v4052_v54  ;;  %v938_v10 = vor.u32 1.1754944e-38, %v937_v16  ;;  %vm4141_vm13 = vmor %vm931_vm15, %vm932_vm5 }
 0x12a   : > { %v4081_v19 = vpop.f32.mrf.mxu0  ;;  %v1154_v44 = vmul.f32 %v4032_v29, %v1153_v50  ;;  %v950_v28 = vand.u32 2147483647, %v4052_v54  ;;  %v952_v31 = vand.u32 2147483648, %v4052_v54  ;;  %v1162_v50 = vand.u32 2147483648, %v3965_v62 }
 0x12b   : > { %5526 = vst [vmem:[#allocation39_spill] sm:$0xff] %v4081_v19  ;;  %v929_v11 = vmul.f32 %v4050_v58, %v928_v15  ;;  %v1174_v17 = vsel %vm4098_vm3, %v4007_v53, %v1170_v35  ;;  %v1160_v19 = vand.u32 2147483647, %v3965_v62  ;;  %v919_v15 = vsel %vm4118_vm9, %v3986_v39, %v915_v59 }
 0x12c   : > { %v1179_v16 = vsel %vm1176_vm10, %v1178_v46, %v1174_v17  ;;  %v1155_v39 = vadd.f32 %v4032_v29, %v1154_v44  ;;  %v1137_v17 = vmul.f32 %v4079_v40, %v4001_v21  ;;  %vm857_vm3 = vweird.f32 %v3878_v22 }
 0x12d   : > { %v930_v41 = vadd.f32 %v4050_v58, %v929_v11  ;;  %v1226_v35 = vmul.f32 %v1179_v16, %v3854_v57  ;;  %vm4156_vm15 = vcmp.eq.f32.partialorder %v1160_v19, 8.507059e+37  ;;  %vm1141_vm4 = vweird.f32 %v4001_v21 }
 0x12e   : > { %v3458_v3 = vpop.eup %3457  ;;  %v1159_v7 = vsel %vm4131_vm11, %v4032_v29, %v1155_v39  ;;  %vm1142_vm5 = vweird.f32 %v4079_v40  ;;  %v1145_v57 = vand.u32 2147483647, %v4001_v21  ;;  %v1163_v29 = vor.u32 1.1754944e-38, %v1162_v50 }
 0x12f   : > { %v942_v53 = vmul.f32 %v3458_v3, %v4052_v54  ;;  %vm947_vm14 = vweird.f32 %v3458_v3  ;;  %v934_v59 = vsel %vm4141_vm13, %v4050_v58, %v930_v41  ;;  %1250 = vmatpush.msrb.mxu2 %v1226_v35  ;;  %v1138_v41 = vsub.f32 1.0, %v1137_v17 }
 0x130   : > { %v1147_v5 = vand.u32 2147483648, %v4001_v21  ;;  %v1122_v62 = vmul.f32 %v4021_v63, %v3957_v36  ;;  %vm4171_vm6 = vcmp.eq.f32.partialorder %v950_v28, 8.507059e+37  ;;  %v924_v49 = vsel %vm4094_vm2, %v4048_v1, %v919_v15  ;;  %vm948_vm13 = vmor %vm946_vm12, %vm947_vm14 }
 0x131   : > { %v943_v11 = vsub.f32 1.0, %v942_v53  ;;  %v953_v53 = vor.u32 1.1754944e-38, %v952_v31  ;;  %v5543_v0 = vand.u32 2147483647, %v3851_v56  ;;  %v939_v28 = vsel %vm4110_vm7, %v938_v10, %v934_v59  ;;  %vm4208_vm12 = vmor %vm1141_vm4, %vm1142_vm5  ;;  %v5576_v31 = vld [vmem:[#allocation37_spill] sm:$0xff] }
 0x132   : > { %v4151_v9 = vpop.f32.mrf.mxu0  ;;  %v1164_v1 = vsel %vm4156_vm15, %v1163_v29, %v1159_v7  ;;  %v1139_v56 = vmul.f32 %v4079_v40, %v1138_v41  ;;  %vm1126_vm2 = vweird.f32 %v3957_v36  ;;  %v5546_v15 = vand.u32 2147483647, %v3843_v47  ;;  %vm4255_vm4 = vmor %vm871_vm1, %vm872_vm0 }
 0x133   : > { %v944_v58 = vmul.f32 %v3458_v3, %v943_v11  ;;  %vm4180_vm9 = vcmp.eq.f32.partialorder %v5543_v0, 8.507059e+37  ;;  %vm841_vm11 = vweird.f32 %v3813_v20  ;;  %v1225_v54 = vmul.f32 %v1164_v1, %v3866_v6  ;;  %v5567_v1 = vld [vmem:[#allocation27_spill] sm:$0xff] }
 0x134   : > { %vm4197_vm10 = vcmp.eq.f32.partialorder %v5546_v15, 8.507059e+37  ;;  %vm827_vm7 = vweird.f32 %v3829_v33  ;;  %v1123_v10 = vsub.f32 1.0, %v1122_v62  ;;  %v1140_v11 = vadd.f32 %v4079_v40, %v1139_v56  ;;  %v5574_v56 = vld [vmem:[#allocation25_spill] sm:$0xff] }
 0x135   : > { %v945_v44 = vadd.f32 %v3458_v3, %v944_v58  ;;  %vm4215_vm14 = vcmp.eq.f32.partialorder %v1145_v57, 8.507059e+37  ;;  %vm1127_vm15 = vweird.f32 %v4021_v63  ;;  %1251 = vmatpush.msrb.mxu2 %v1225_v54  ;;  %v1130_v35 = vand.u32 2147483647, %v3957_v36 }
 0x136   : > { %v1124_v21 = vmul.f32 %v4021_v63, %v1123_v10  ;;  %v1132_v7 = vand.u32 2147483648, %v3957_v36  ;;  %v1210_v50 = vmul.f32 %v939_v28, %v3922_v38  ;;  %v1144_v17 = vsel %vm4208_vm12, %v4079_v40, %v1140_v11  ;;  %v5566_v28 = vld [vmem:[#allocation22_spill] sm:$0xff]  ;;  %v5578_v10 = vld [vmem:[#allocation21_spill] sm:$0xff]  ;;  %v5588_v40 = vld [vmem:[#allocation19_spill] sm:$0xff] }
 0x137   : > { %v949_v51 = vsel %vm948_vm13, %v3458_v3, %v945_v44  ;;  %v1148_v3 = vor.u32 1.1754944e-38, %v1147_v5  ;;  %v1107_v58 = vmul.f32 %v3998_v37, %v3945_v61  ;;  %vm1111_vm13 = vweird.f32 %v3945_v61  ;;  %v5589_v36 = vld [vmem:[#allocation24_spill] sm:$0xff] }
 0x138   : > { %v954_v39 = vsel %vm4171_vm6, %v953_v53, %v949_v51  ;;  %vm4234_vm6 = vmor %vm1126_vm2, %vm1127_vm15  ;;  %vm811_vm5 = vweird.f32 %v3809_v18  ;;  %v1125_v38 = vadd.f32 %v4021_v63, %v1124_v21  ;;  %vm4245_vm12 = vcmp.eq.f32.partialorder %v1130_v35, 8.507059e+37  ;;  %v5584_v21 = vld [vmem:[#allocation34_spill] sm:$0xff] }
 0x139   : > { %v1211_v6 = vmul.f32 %v954_v39, %v3972_v27  ;;  %v1149_v57 = vsel %vm4215_vm14, %v1148_v3, %v1144_v17  ;;  %vm797_vm2 = vweird.f32 %v3823_v26  ;;  %vm1112_vm15 = vweird.f32 %v3998_v37  ;;  %v5579_v39 = vld [vmem:[#allocation26_spill] sm:$0xff] }
 0x13a   : > { %v4226_v46 = vpop.f32.mrf.mxu0  ;;  %v1224_v29 = vmul.f32 %v1149_v57, %v3893_v48  ;;  %v1133_v41 = vor.u32 1.1754944e-38, %v1132_v7  ;;  %v1108_v5 = vsub.f32 1.0, %v1107_v58  ;;  %v1115_v62 = vand.u32 2147483647, %v3945_v61  ;;  %v5587_v58 = vld [vmem:[#allocation36_spill] sm:$0xff] }
 0x13b   : > { %1229 = vmatpush.msrb.mxu1 %v1211_v6  ;;  %v1209_v44 = vmul.f32 %v924_v49, %v3882_v23  ;;  %v874_v19 = vsel %vm4255_vm4, %v3904_v13, %v3996_v52  ;;  %v1129_v53 = vsel %vm4234_vm6, %v4021_v63, %v1125_v38  ;;  %vm796_vm0 = vweird.f32 %v3789_v4 }
 0x13c   : > { %v1117_v48 = vand.u32 2147483648, %v3945_v61  ;;  %vm782_vm1 = vweird.f32 %v3819_v24  ;;  %v5559_v23 = vsel %vm4026_vm8, %v3912_v30, %v4004_v34  ;;  %v5560_v52 = vand.u32 2147483648, %v3843_v47  ;;  %1252 = vmatpush.msrb.mxu2 %v1224_v29  ;;  %vm4304_vm8 = vmor %vm1111_vm13, %vm1112_vm15 }
 0x13d   : > { %1230 = vmatpush.msrb.mxu1 %v1210_v50  ;;  %v894_v49 = vsel %vm4180_vm9, %v3984_v55, %v5559_v23  ;;  %vm5561_vm14 = vweird.f32 %v3821_v25  ;;  %v1134_v43 = vsel %vm4245_vm12, %v1133_v41, %v1129_v53  ;;  %v1109_v30 = vmul.f32 %v3998_v37, %v1108_v5  ;;  %v5585_v50 = vld [vmem:[#allocation20_spill] sm:$0xff]  ;;  %v5597_v23 = vld [vmem:[#allocation33_spill] sm:$0xff] }
 0x13e   : > { %v878_v13 = vor.u32 1.1754944e-38, %v5560_v52  ;;  %vm4286_vm4 = vmor %vm5561_vm14, %vm857_vm3  ;;  %v1208_v34 = vmul.f32 %v4087_v14, %v3827_v32  ;;  %v1223_v55 = vmul.f32 %v1134_v43, %v3838_v45  ;;  %v1118_v16 = vor.u32 1.1754944e-38, %v1117_v48  ;;  %v5594_v5 = vld [vmem:[#allocation28_spill] sm:$0xff]  ;;  %v5598_v52 = vld [vmem:[#allocation18_spill] sm:$0xff] }
 0x13f   : > { %1231 = vmatpush.msrb.mxu1 %v1209_v44  ;;  %v859_v47 = vsel %vm4286_vm4, %v3878_v22, %v3969_v42  ;;  %vm781_vm3 = vweird.f32 %v5566_v28  ;;  %vm767_vm9 = vweird.f32 %v5567_v1  ;;  %v5568_v42 = vand.u32 2147483648, %v3821_v25  ;;  %v5595_v44 = vld [vmem:[#allocation17_spill] sm:$0xff] }
 0x140   : > { %v879_v32 = vsel %vm4197_vm10, %v878_v13, %v874_v19  ;;  %vm5569_vm6 = vweird.f32 %v3871_v12  ;;  %v1110_v61 = vadd.f32 %v3998_v37, %v1109_v30  ;;  %vm4323_vm13 = vcmp.eq.f32.partialorder %v1115_v62, 8.507059e+37  ;;  %1253 = vmatpush.msrb.mxu2 %v1223_v55  ;;  %v5599_v13 = vld [vmem:[#allocation23_spill] sm:$0xff] }
 0x141   : > { %v863_v22 = vor.u32 1.1754944e-38, %v5568_v42  ;;  %vm4318_vm12 = vmor %vm841_vm11, %vm5569_vm6  ;;  %1232 = vmatpush.msrb.mxu1 %v1208_v34  ;;  %v1207_v51 = vmul.f32 %v894_v49, %v5574_v56  ;;  %v5575_v15 = vand.u32 2147483647, %v3821_v25  ;;  %v810_v3 = vadd.f32 %v3862_v2, %v5577_v60  ;;  %v5608_v56 = vld [vmem:[#allocation13_spill] sm:$0xff] }
 0x142   : > { %v844_v54 = vsel %vm4318_vm12, %v3871_v12, %v5576_v31  ;;  %vm766_vm11 = vweird.f32 %v5578_v10  ;;  %vm752_vm15 = vweird.f32 %v5579_v39  ;;  %v4338_v11 = vpop.f32.mrf.mxu0  ;;  %v5580_v6 = vand.u32 2147483648, %v3813_v20  ;;  %v5610_v31 = vld [vmem:[#allocation32_spill] sm:$0xff] }
 0x143   : > { %vm861_vm10 = vcmp.eq.f32.partialorder %v5575_v15, 8.507059e+37  ;;  %vm5581_vm14 = vweird.f32 %v3796_v8  ;;  %v795_v35 = vadd.f32 %v3823_v26, %v5584_v21  ;;  %v1114_v7 = vsel %vm4304_vm8, %v3998_v37, %v1110_v61  ;;  %1233 = vmatpush.msrb.mxu1 %v1207_v51  ;;  %v5614_v21 = vld [vmem:[#allocation30_spill] sm:$0xff] }
 0x144   : > { %v864_v59 = vsel %vm861_vm10, %v863_v22, %v859_v47  ;;  %v848_v25 = vor.u32 1.1754944e-38, %v5580_v6  ;;  %vm4346_vm4 = vmor %vm5581_vm14, %vm827_vm7  ;;  %v1206_v17 = vmul.f32 %v879_v32, %v5585_v50  ;;  %v5586_v27 = vand.u32 2147483647, %v3813_v20  ;;  %v5603_v47 = vld [vmem:[#allocation15_spill] sm:$0xff]  ;;  %v5621_v20 = vld [vmem:[#allocation16_spill] sm:$0xff] }
 0x145   : > { %v829_v57 = vsel %vm4346_vm4, %v3829_v33, %v5587_v58  ;;  %v1119_v38 = vsel %vm4323_vm13, %v1118_v16, %v1114_v7  ;;  %vm751_vm7 = vweird.f32 %v5588_v40  ;;  %vm737_vm12 = vweird.f32 %v5589_v36  ;;  %vm4394_vm4 = vmor %vm796_vm0, %vm797_vm2  ;;  %v5605_v32 = vld [vmem:[#allocation31_spill] sm:$0xff]  ;;  %v5617_v58 = vld [vmem:[#allocation12_spill] sm:$0xff] }
 0x146   : > { %vm846_vm6 = vcmp.eq.f32.partialorder %v5586_v27, 8.507059e+37  ;;  %v5590_v37 = vand.u32 2147483648, %v3796_v8  ;;  %vm5591_vm8 = vweird.f32 %v3862_v2  ;;  %v802_v33 = vand.u32 2147483648, %v3789_v4  ;;  %1234 = vmatpush.msrb.mxu1 %v1206_v17  ;;  %vm4412_vm2 = vmor %vm781_vm3, %vm782_vm1 }
 0x147   : > { %v849_v29 = vsel %vm846_vm6, %v848_v25, %v844_v54  ;;  %vm4372_vm10 = vmor %vm811_vm5, %vm5591_vm8  ;;  %v1222_v62 = vmul.f32 %v1119_v38, %v5594_v5  ;;  %v1205_v19 = vmul.f32 %v864_v59, %v5595_v44  ;;  %v5596_v53 = vand.u32 2147483647, %v3796_v8  ;;  %v5618_v38 = vld [vmem:[#allocation29_spill] sm:$0xff]  ;;  %v5622_v5 = vld [vmem:[#allocation11_spill] sm:$0xff] }
 0x148   : > { %v833_v41 = vor.u32 1.1754944e-38, %v5590_v37  ;;  %v814_v48 = vsel %vm4372_vm10, %v3862_v2, %v810_v3  ;;  %v780_v49 = vadd.f32 %v3819_v24, %v5597_v23  ;;  %vm736_vm5 = vweird.f32 %v5598_v52  ;;  %vm4430_vm1 = vmor %vm766_vm11, %vm767_vm9  ;;  %v5624_v23 = vld [vmem:[#allocation6_spill] sm:$0xff] }
 0x149   : > { %vm831_vm13 = vcmp.eq.f32.partialorder %v5596_v53, 8.507059e+37  ;;  %vm722_vm14 = vweird.f32 %v5599_v13  ;;  %v5600_v43 = vand.u32 2147483648, %v3809_v18  ;;  %1254 = vmatpush.msrb.mxu2 %v1222_v62  ;;  %v785_v2 = vand.u32 2147483647, %v5566_v28  ;;  %1235 = vmatpush.msrb.mxu1 %v1205_v19  ;;  %vm4446_vm9 = vmor %vm751_vm7, %vm752_vm15 }
 0x14a   : > { %v834_v63 = vsel %vm831_vm13, %v833_v41, %v829_v57  ;;  %v787_v34 = vand.u32 2147483648, %v5566_v28  ;;  %v1204_v55 = vmul.f32 %v849_v29, %v5603_v47  ;;  %v5604_v0 = vand.u32 2147483647, %v3809_v18  ;;  %v560_v54 = vpop.f32.mrf.mxu0  ;;  %vm4462_vm15 = vmor %vm736_vm5, %vm737_vm12  ;;  %v5627_v47 = vld [vmem:[#allocation9_spill] sm:$0xff] }
 0x14b   : > { %v818_v30 = vor.u32 1.1754944e-38, %v5600_v43  ;;  %v799_v16 = vsel %vm4394_vm4, %v3823_v26, %v795_v35  ;;  %v765_v42 = vadd.f32 %v5567_v1, %v5605_v32  ;;  %v803_v45 = vor.u32 1.1754944e-38, %v802_v33 }
 0x14c   : > { %vm816_vm6 = vcmp.eq.f32.partialorder %v5604_v0, 8.507059e+37  ;;  %v770_v18 = vand.u32 2147483647, %v5578_v10  ;;  %v772_v14 = vand.u32 2147483648, %v5578_v10  ;;  %1236 = vmatpush.msrb.mxu1 %v1204_v55  ;;  %v1203_v26 = vmul.f32 %v834_v63, %v5608_v56 }
 0x14d   : > { %v819_v22 = vsel %vm816_vm6, %v818_v30, %v814_v48  ;;  %v5609_v51 = vand.u32 2147483647, %v3789_v4  ;;  %v784_v15 = vsel %vm4412_vm2, %v3819_v24, %v780_v49  ;;  %v750_v28 = vadd.f32 %v5579_v39, %v5610_v31  ;;  %v5613_v24 = vld [vmem:[#allocation14_spill] sm:$0xff] }
 0x14e   : > { %v788_v3 = vor.u32 1.1754944e-38, %v787_v34  ;;  %v755_v4 = vand.u32 2147483647, %v5588_v40  ;;  %v757_v6 = vand.u32 2147483648, %v5588_v40  ;;  %1237 = vmatpush.msrb.mxu1 %v1203_v26  ;;  %v1202_v25 = vmul.f32 %v819_v22, %v5613_v24  ;;  %v5623_v48 = vld [vmem:[#allocation38_spill] sm:$0xff] }
 0x14f   : > { %vm801_vm0 = vcmp.eq.f32.partialorder %v5609_v51, 8.507059e+37  ;;  %vm786_vm3 = vcmp.eq.f32.partialorder %v785_v2, 8.507059e+37  ;;  %v769_v12 = vsel %vm4430_vm1, %v5567_v1, %v765_v42  ;;  %v735_v35 = vadd.f32 %v5589_v36, %v5614_v21  ;;  %v5626_v2 = vld [vmem:[#allocation39_spill] sm:$0xff]  ;;  %v5628_v42 = vld [vmem:[#allocation8_spill] sm:$0xff] }
 0x150   : > { %v804_v60 = vsel %vm801_vm0, %v803_v45, %v799_v16  ;;  %v789_v10 = vsel %vm786_vm3, %v788_v3, %v784_v15  ;;  %v773_v7 = vor.u32 1.1754944e-38, %v772_v14  ;;  %v740_v17 = vand.u32 2147483647, %v5598_v52  ;;  %1238 = vmatpush.msrb.mxu1 %v1202_v25  ;;  %v5629_v14 = vld [vmem:[#allocation7_spill] sm:$0xff] }
 0x151   : > { %v742_v27 = vand.u32 2147483648, %v5598_v52  ;;  %v1201_v1 = vmul.f32 %v804_v60, %v5617_v58  ;;  %vm771_vm11 = vcmp.eq.f32.partialorder %v770_v18, 8.507059e+37  ;;  %v754_v57 = vsel %vm4446_vm9, %v5579_v39, %v750_v28  ;;  %v5625_v52 = vld [vmem:[#allocation10_spill] sm:$0xff] }
 0x152   : > { %v720_v29 = vadd.f32 %v5599_v13, %v5618_v38  ;;  %v774_v40 = vsel %vm771_vm11, %v773_v7, %v769_v12  ;;  %v758_v37 = vor.u32 1.1754944e-38, %v757_v6  ;;  %vm721_vm7 = vweird.f32 %v5621_v20  ;;  %v563_v30 = vpop.f32.mrf.mxu0 }
 0x153   : > { %v727_v33 = vand.u32 2147483648, %v5621_v20  ;;  %1239 = vmatpush.msrb.mxu1 %v1201_v1  ;;  %v1200_v39 = vmul.f32 %v789_v10, %v5622_v5  ;;  %vm756_vm8 = vcmp.eq.f32.partialorder %v755_v4, 8.507059e+37  ;;  %v739_v62 = vsel %vm4462_vm15, %v5589_v36, %v735_v35  ;;  %vm723_vm12 = vmor %vm721_vm7, %vm722_vm14 }
 0x154   : > { %v725_v44 = vand.u32 2147483647, %v5621_v20  ;;  %v759_v19 = vsel %vm756_vm8, %v758_v37, %v754_v57  ;;  %v743_v53 = vor.u32 1.1754944e-38, %v742_v27  ;;  %v4477_v49 = vadd.f32 %v5624_v23, %v5623_v48 }
 0x155   : > { %1240 = vmatpush.msrb.mxu1 %v1200_v39  ;;  %v1199_v63 = vmul.f32 %v774_v40, %v5625_v52  ;;  %vm741_vm10 = vcmp.eq.f32.partialorder %v740_v17, 8.507059e+37  ;;  %v724_v43 = vsel %vm723_vm12, %v5599_v13, %v720_v29  ;;  %v728_v36 = vor.u32 1.1754944e-38, %v727_v33 }
 0x156   : > { %v744_v8 = vsel %vm741_vm10, %v743_v53, %v739_v62  ;;  %v4483_v34 = vadd.f32 %v5624_v23, %v5626_v2  ;;  %v1198_v55 = vmul.f32 %v759_v19, %v5627_v47  ;;  %vm726_vm13 = vcmp.eq.f32.partialorder %v725_v44, 8.507059e+37 }
 0x157   : > { %1241 = vmatpush.msrb.mxu1 %v1199_v63  ;;  %v4488_v0 = vadd.f32 %v5624_v23, %v4151_v9  ;;  %v729_v16 = vsel %vm726_vm13, %v728_v36, %v724_v43  ;;  %v2629_v32 = vmul.f32 -1.442695, %v4477_v49  ;;  %v4493_v13 = vadd.f32 %v5624_v23, %v4226_v46  ;;  %v3503_v9 = vld [vmem:[%s5443_s2] ss:$0 sm:$0xff] }
 0x158   : > { %v1197_v22 = vmul.f32 %v744_v8, %v5628_v42  ;;  %v4498_v45 = vadd.f32 %v5624_v23, %v4338_v11  ;;  %v2630_v61 = vmul.f32 -1.442695, %v4483_v34  ;;  %v4504_v18 = vadd.f32 %v3503_v9, %v560_v54 }
 0x159   : > { %1242 = vmatpush.msrb.mxu1 %v1198_v55  ;;  %v1196_v56 = vmul.f32 %v729_v16, %v5629_v14  ;;  %v2631_v46 = vmul.f32 -1.442695, %v4488_v0  ;;  %v4508_v26 = vadd.f32 %v3503_v9, %v563_v30  ;;  %3459 = vpow2.f32 %v2629_v32 }
 0x15a   : > { %v2632_v51 = vmul.f32 -1.442695, %v4493_v13  ;;  %v2633_v11 = vmul.f32 -1.442695, %v4498_v45  ;;  %v565_v15 = vpop.f32.mrf.mxu0  ;;  %3461 = vpow2.f32 %v2630_v61  ;;  %v2634_v31 = vmul.f32 -1.442695, %v4504_v18 }
 0x15b   : > { %1243 = vmatpush.msrb.mxu1 %v1197_v22  ;;  %v4513_v28 = vadd.f32 %v3503_v9, %v565_v15  ;;  %3463 = vpow2.f32 %v2631_v46  ;;  %v2635_v54 = vmul.f32 -1.442695, %v4508_v26 }
 0x15c   : > { %3465 = vpow2.f32 %v2632_v51 }
 0x15d   : > { %1244 = vmatpush.msrb.mxu1 %v1196_v56  ;;  %v2636_v60 = vmul.f32 -1.442695, %v4513_v28  ;;  %3467 = vpow2.f32 %v2633_v11 }
 0x15e   : > { %3469 = vpow2.f32 %v2634_v31 }
 0x15f   : > { %v3460_v3 = vpop.eup %3459  ;;  %3471 = vpow2.f32 %v2635_v54 }
 0x160   : > { %v3462_v59 = vpop.eup %3461  ;;  %3473 = vpow2.f32 %v2636_v60  ;;  %v4517_v6 = vadd.f32 1.0, %v3460_v3 }
 0x161   : > { %v3464_v4 = vpop.eup %3463  ;;  %v4521_v35 = vadd.f32 1.0, %v3462_v59 }
 0x162   : > { %v568_v24 = vpop.f32.mrf.mxu0  ;;  %v3466_v25 = vpop.eup %3465  ;;  %v4523_v7 = vadd.f32 1.0, %v3464_v4  ;;  %3475 = vrcp.f32 %v4517_v6 }
 0x163   : > { %v4519_v12 = vadd.f32 %v3503_v9, %v568_v24  ;;  %v3468_v21 = vpop.eup %3467  ;;  %v4527_v27 = vadd.f32 1.0, %v3466_v25 }
 0x164   : > { %v3470_v10 = vpop.eup %3469  ;;  %v4529_v1 = vadd.f32 1.0, %v3468_v21  ;;  %v997_v56 = vand.u32 2147483648, %v4523_v7 }
 0x165   : > { %v2637_v50 = vmul.f32 -1.442695, %v4519_v12  ;;  %v3472_v17 = vpop.eup %3471  ;;  %v4532_v57 = vadd.f32 1.0, %v3470_v10  ;;  %v1010_v3 = vand.u32 2147483647, %v4527_v27  ;;  %vm1006_vm13 = vweird.f32 %v4527_v27 }
 0x166   : > { %v3474_v58 = vpop.eup %3473  ;;  %v4535_v38 = vadd.f32 1.0, %v3472_v17  ;;  %v1025_v10 = vand.u32 2147483647, %v4529_v1  ;;  %vm1021_vm11 = vweird.f32 %v4529_v1 }
 0x167   : > { %3477 = vpow2.f32 %v2637_v50  ;;  %v4538_v29 = vadd.f32 1.0, %v3474_v58  ;;  %v1040_v25 = vand.u32 2147483647, %v4532_v57  ;;  %v1042_v21 = vand.u32 2147483648, %v4532_v57 }
 0x168   : > { %3479 = vrcp.f32 %v4521_v35  ;;  %v4543_v41 = vpop.eup %3475  ;;  %v1055_v17 = vand.u32 2147483647, %v4535_v38  ;;  %v1057_v58 = vand.u32 2147483648, %v4535_v38  ;;  %vm1051_vm5 = vweird.f32 %v4535_v38 }
 0x169   : > { %3481 = vrcp.f32 %v4523_v7  ;;  %v957_v52 = vmul.f32 %v4543_v41, %v4517_v6  ;;  %vm1036_vm0 = vweird.f32 %v4532_v57  ;;  %vm1066_vm8 = vweird.f32 %v4538_v29 }
 0x16a   : > { %3483 = vrcp.f32 %v4527_v27  ;;  %v570_v40 = vpop.f32.mrf.mxu0 }
 0x16b   : > { %3485 = vrcp.f32 %v4529_v1  ;;  %v4541_v37 = vadd.f32 %v3503_v9, %v570_v40  ;;  %v958_v22 = vsub.f32 1.0, %v957_v52  ;;  %v995_v9 = vand.u32 2147483647, %v4523_v7 }
 0x16c   : > { %3487 = vrcp.f32 %v4532_v57 }
 0x16d   : > { %v3478_v20 = vpop.eup %3477  ;;  %3489 = vrcp.f32 %v4535_v38  ;;  %v2638_v33 = vmul.f32 -1.442695, %v4541_v37  ;;  %v4598_v4 = vmul.f32 %v4543_v41, %v958_v22  ;;  %v2839_v22 = vld [vmem:[%s5444_s3 + $0x180] sm:$0xf] }
 0x16e   : > { %v4548_v5 = vpop.eup %3479  ;;  %3491 = vrcp.f32 %v4538_v29  ;;  %v4551_v39 = vadd.f32 1.0, %v3478_v20 }
 0x16f   : > { %v4553_v62 = vpop.eup %3481  ;;  %3493 = vpow2.f32 %v2638_v33  ;;  %v972_v23 = vmul.f32 %v4548_v5, %v4521_v35 }
 0x170   : > { %v4555_v44 = vpop.eup %3483  ;;  %3495 = vrcp.f32 %v4551_v39  ;;  %v987_v30 = vmul.f32 %v4553_v62, %v4523_v7  ;;  %vm1081_vm3 = vweird.f32 %v4551_v39 }
 0x171   : > { %v4558_v19 = vpop.eup %3485  ;;  %v1002_v55 = vmul.f32 %v4555_v44, %v4527_v27  ;;  %v973_v42 = vsub.f32 1.0, %v972_v23  ;;  %vm1007_vm15 = vweird.f32 %v4555_v44 }
 0x172   : > { %v4560_v53 = vpop.eup %3487  ;;  %v1017_v47 = vmul.f32 %v4558_v19, %v4529_v1  ;;  %v988_v54 = vsub.f32 1.0, %v987_v30  ;;  %v2871_v30 = vld [vmem:[%s5444_s3 + $0x1c0] sm:$0xf]  ;;  %vm1022_vm1 = vweird.f32 %v4558_v19 }
 0x173   : > { %v4562_v48 = vpop.eup %3489  ;;  %v1032_v2 = vmul.f32 %v4560_v53, %v4532_v57  ;;  %v1003_v31 = vsub.f32 1.0, %v1002_v55  ;;  %v4595_v59 = vmul.f32 %v4548_v5, %v973_v42  ;;  %vm1037_vm4 = vweird.f32 %v4560_v53  ;;  %v2873_v42 = vld [vmem:[%s5444_s3 + $0x1e0] sm:$0xf0] }
 0x174   : > { %v4568_v63 = vpop.eup %3491  ;;  %v1047_v61 = vmul.f32 %v4562_v48, %v4535_v38  ;;  %v1018_v15 = vsub.f32 1.0, %v1017_v47  ;;  %v4616_v52 = vmul.f32 %v4553_v62, %v988_v54  ;;  %v3235_v47 = vld [vmem:[%s5444_s3 + $0x1c4] sm:$0xf]  ;;  %vm1052_vm14 = vweird.f32 %v4562_v48 }
 0x175   : > { %v3494_v43 = vpop.eup %3493  ;;  %v1062_v32 = vmul.f32 %v4568_v63, %v4538_v29  ;;  %v1033_v11 = vsub.f32 1.0, %v1032_v2  ;;  %v4613_v23 = vmul.f32 %v4555_v44, %v1003_v31  ;;  %v3239_v2 = vld [vmem:[%s5444_s3 + $0x1dc] sm:$0xf0]  ;;  %vm1067_vm6 = vweird.f32 %v4568_v63  ;;  %v3227_v31 = vld [vmem:[%s5444_s3 + $0x184] sm:$0xf] }
 0x176   : > { %v4572_v8 = vpop.eup %3495  ;;  %v4574_v36 = vadd.f32 1.0, %v3494_v43  ;;  %v1048_v24 = vsub.f32 1.0, %v1047_v61  ;;  %v4610_v33 = vmul.f32 %v4558_v19, %v1018_v15  ;;  %v5482_v43 = vmov 1.0   ;;  %v3231_v61 = vld [vmem:[%s5444_s3 + $0x19c] sm:$0xf0]  ;;  %vm4694_vm10 = vmor %vm1066_vm8, %vm1067_vm6 }
 0x177   : > { %v1077_v16 = vmul.f32 %v4572_v8, %v4551_v39  ;;  %v1063_v60 = vsub.f32 1.0, %v1062_v32  ;;  %v1034_v20 = vmul.f32 %v4560_v53, %v1033_v11  ;;  %1245 = vmatmul.f32.vlgmr.msrb.gmra.mxu1 %v5482_v43  ;;  %v2872_v32 = vor.u32 %v3239_v2, %v2871_v30  ;;  %v2841_v54 = vld [vmem:[%s5444_s3 + $0x1a0] sm:$0xf0] }
 0x178   : > { %3497 = vrcp.f32 %v4574_v36  ;;  %v1049_v11 = vmul.f32 %v4562_v48, %v1048_v24  ;;  %v2876_v15 = vor.u32 %v3235_v47, %v2873_v42  ;;  %vm1082_vm2 = vweird.f32 %v4572_v8 }
 0x179   : > { %v1078_v14 = vsub.f32 1.0, %v1077_v16  ;;  %v1064_v16 = vmul.f32 %v4568_v63, %v1063_v60  ;;  %1679 = vmatpush.bf16.msra.mxu3 %v2872_v32  ;;  %v2840_v24 = vor.u32 %v3231_v61, %v2839_v22  ;;  %v1102_v2 = vand.u32 2147483648, %v4574_v36  ;;  %v2809_v61 = vld [vmem:[%s5444_s3 + $0x160] sm:$0xf0]  ;;  %vm4679_vm7 = vmor %vm1081_vm3, %vm1082_vm2 }
 0x17a   : > { %v1087_v47 = vand.u32 2147483648, %v4551_v39  ;;  %1692 = vmatpush.bf16.msra.mxu1 %v2876_v15  ;;  %v2844_v42 = vor.u32 %v3227_v31, %v2841_v54  ;;  %v1100_v32 = vand.u32 2147483647, %v4574_v36  ;;  %v1072_v31 = vand.u32 2147483648, %v4538_v29  ;;  %v2775_v15 = vld [vmem:[%s5444_s3 + $0x100] sm:$0xf] }
 0x17b   : > { %v1079_v50 = vmul.f32 %v4572_v8, %v1078_v14  ;;  %v1085_v14 = vand.u32 2147483647, %v4551_v39  ;;  %v1065_v22 = vadd.f32 %v4568_v63, %v1064_v16  ;;  %v3219_v39 = vld [vmem:[%s5444_s3 + $0x144] sm:$0xf]  ;;  %v1070_v16 = vand.u32 2147483647, %v4538_v29 }
 0x17c   : > { %v1050_v54 = vadd.f32 %v4562_v48, %v1049_v11  ;;  %vm1096_vm12 = vweird.f32 %v4574_v36  ;;  %vm992_vm2 = vweird.f32 %v4553_v62  ;;  %v1035_v11 = vadd.f32 %v4560_v53, %v1034_v20 }
 0x17d   : > { %v1080_v30 = vadd.f32 %v4572_v8, %v1079_v50  ;;  %v2807_v50 = vld [vmem:[%s5444_s3 + $0x140] sm:$0xf]  ;;  %1680 = vmatpush.bf16.msra.mxu3 %v2840_v24  ;;  %vm1101_vm6 = vcmp.eq.f32.partialorder %v1100_v32, 8.507059e+37  ;;  %v1069_v20 = vsel %vm4694_vm10, %v4568_v63, %v1065_v22  ;;  %vm977_vm8 = vweird.f32 %v4548_v5  ;;  %v3187_v63 = vld [vmem:[%s5444_s3 + $0x44] sm:$0xf] }
 0x17e   : > { %v4606_v40 = vpop.eup %3497  ;;  %1693 = vmatpush.bf16.msra.mxu1 %v2844_v42  ;;  %v3215_v24 = vld [vmem:[%s5444_s3 + $0x11c] sm:$0xf0]  ;;  %v1020_v51 = vadd.f32 %v4558_v19, %v4610_v33  ;;  %vm1071_vm10 = vcmp.eq.f32.partialorder %v1070_v16, 8.507059e+37 }
 0x17f   : > { %v1092_v55 = vmul.f32 %v4606_v40, %v4574_v36  ;;  %vm1097_vm9 = vweird.f32 %v4606_v40  ;;  %v1084_v46 = vsel %vm4679_vm7, %v4572_v8, %v1080_v30  ;;  %v1088_v8 = vor.u32 1.1754944e-38, %v1087_v47  ;;  %v2777_v47 = vld [vmem:[%s5444_s3 + $0x120] sm:$0xf0] }
 0x180   : > { %vm4702_vm3 = vmor %vm1096_vm12, %vm1097_vm9  ;;  %v2812_v30 = vor.u32 %v3219_v39, %v2809_v61  ;;  %vm1086_vm9 = vcmp.eq.f32.partialorder %v1085_v14, 8.507059e+37  ;;  %vm991_vm7 = vweird.f32 %v4523_v7  ;;  %v1058_v39 = vor.u32 1.1754944e-38, %v1057_v58  ;;  %v2743_v61 = vld [vmem:[%s5444_s3 + $0xc0] sm:$0xf]  ;;  %v2791_v7 = vld [vmem:[%s5444_s3 + $0x110] sm:$0xf] }
 0x181   : > { %v1093_v60 = vsub.f32 1.0, %v1092_v55  ;;  %v3223_v55 = vld [vmem:[%s5444_s3 + $0x15c] sm:$0xf0]  ;;  %vm4731_vm12 = vmor %vm1051_vm5, %vm1052_vm14  ;;  %vm1056_vm14 = vcmp.eq.f32.partialorder %v1055_v17, 8.507059e+37  ;;  %v990_v17 = vadd.f32 %v4553_v62, %v4616_v52  ;;  %v5652_v52 = vmov 1.0  }
 0x182   : > { %v2808_v29 = vor.u32 %v3223_v55, %v2807_v50  ;;  %v1073_v55 = vor.u32 1.1754944e-38, %v1072_v31  ;;  %v1054_v32 = vsel %vm4731_vm12, %v4562_v48, %v1050_v54  ;;  %vm4748_vm5 = vmor %vm1036_vm0, %vm1037_vm4  ;;  %1694 = vmatpush.bf16.msra.mxu1 %v2812_v30  ;;  %v3207_v58 = vld [vmem:[%s5444_s3 + $0xdc] sm:$0xf0]  ;;  %v1005_v54 = vadd.f32 %v4555_v44, %v4613_v23 }
 0x183   : > { %v1094_v43 = vmul.f32 %v4606_v40, %v1093_v60  ;;  %v1039_v31 = vsel %vm4748_vm5, %v4560_v53, %v1035_v11  ;;  %v1059_v36 = vsel %vm1056_vm14, %v1058_v39, %v1054_v32  ;;  %vm4779_vm4 = vmor %vm1021_vm11, %vm1022_vm1  ;;  %v1012_v53 = vand.u32 2147483648, %v4527_v27 }
 0x184   : > { %1681 = vmatpush.bf16.msra.mxu3 %v2808_v29  ;;  %v1074_v22 = vsel %vm1071_vm10, %v1073_v55, %v1069_v20  ;;  %v2745_v29 = vld [vmem:[%s5444_s3 + $0xe0] sm:$0xf0]  ;;  %vm1041_vm0 = vcmp.eq.f32.partialorder %v1040_v25, 8.507059e+37  ;;  %vm4796_vm1 = vmor %vm1006_vm13, %vm1007_vm15  ;;  %v3199_v25 = vld [vmem:[%s5444_s3 + $0x9c] sm:$0xf0]  ;;  %v1218_v30 = vmul.f32 %v1059_v36, %v4508_v26  ;;  %vm1026_vm11 = vcmp.eq.f32.partialorder %v1025_v10, 8.507059e+37 }
 0x185   : > { %v1095_v60 = vadd.f32 %v4606_v40, %v1094_v43  ;;  %v1103_v43 = vor.u32 1.1754944e-38, %v1102_v2  ;;  %v3211_v2 = vld [vmem:[%s5444_s3 + $0x104] sm:$0xf]  ;;  %v1219_v23 = vmul.f32 %v1074_v22, %v4513_v28  ;;  %v975_v28 = vadd.f32 %v4548_v5, %v4595_v59  ;;  %vm4825_vm13 = vmor %vm991_vm7, %vm992_vm2  ;;  %v3241_v36 = vld [vmem:[%s5444_s3 + $0x1ec] sm:$0xf0] }
 0x186   : > { %v2780_v48 = vor.u32 %v3211_v2, %v2777_v47  ;;  %v1009_v59 = vsel %vm4796_vm1, %v4555_v44, %v1005_v54  ;;  %vm962_vm15 = vweird.f32 %v4543_v41  ;;  %v1013_v20 = vor.u32 1.1754944e-38, %v1012_v53 }
 0x187   : > { %v1099_v50 = vsel %vm4702_vm3, %v4606_v40, %v1095_v60  ;;  %v1089_v40 = vsel %vm1086_vm9, %v1088_v8, %v1084_v46  ;;  %vm976_vm3 = vweird.f32 %v4521_v35  ;;  %v2776_v46 = vor.u32 %v3215_v24, %v2775_v15  ;;  %v3203_v60 = vld [vmem:[%s5444_s3 + $0xc4] sm:$0xf] }
 0x188   : > { %v1104_v42 = vsel %vm1101_vm6, %v1103_v43, %v1099_v50  ;;  %v1220_v16 = vmul.f32 %v1089_v40, %v4519_v12  ;;  %v1043_v12 = vor.u32 1.1754944e-38, %v1042_v21  ;;  %v1024_v21 = vsel %vm4779_vm4, %v4558_v19, %v1020_v51  ;;  %1695 = vmatpush.bf16.msra.mxu1 %v2780_v48  ;;  %v2711_v19 = vld [vmem:[%s5444_s3 + $0x80] sm:$0xf]  ;;  %v3195_v15 = vld [vmem:[%s5444_s3 + $0x84] sm:$0xf]  ;;  %vm4844_vm2 = vmor %vm976_vm3, %vm977_vm8 }
 0x189   : > { %v1221_v14 = vmul.f32 %v1104_v42, %v4541_v37  ;;  %v1027_v37 = vand.u32 2147483648, %v4529_v1  ;;  %1682 = vmatpush.bf16.msra.mxu3 %v2776_v46  ;;  %v2744_v43 = vor.u32 %v3207_v58, %v2743_v61  ;;  %v2748_v57 = vor.u32 %v3203_v60, %v2745_v29  ;;  %v2713_v24 = vld [vmem:[%s5444_s3 + $0xa0] sm:$0xf0]  ;;  %v2887_v29 = vld [vmem:[%s5444_s3 + $0x1d0] sm:$0xf] }
 0x18a   : > { %v1044_v8 = vsel %vm1041_vm0, %v1043_v12, %v1039_v31  ;;  %v960_v1 = vadd.f32 %v4543_v41, %v4598_v4  ;;  %v965_v44 = vand.u32 2147483647, %v4517_v6  ;;  %vm1011_vm6 = vcmp.eq.f32.partialorder %v1010_v3, 8.507059e+37  ;;  %v2681_v51 = vld [vmem:[%s5444_s3 + $0x60] sm:$0xf0] }
 0x18b   : > { %1255 = vmatpush.msrb.mxu2 %v1221_v14  ;;  %v1028_v11 = vor.u32 1.1754944e-38, %v1027_v37  ;;  %v1217_v10 = vmul.f32 %v1044_v8, %v4504_v18  ;;  %v994_v2 = vsel %vm4825_vm13, %v4553_v62, %v990_v17  ;;  %v2712_v47 = vor.u32 %v3199_v25, %v2711_v19  ;;  %v2679_v62 = vld [vmem:[%s5444_s3 + $0x40] sm:$0xf]  ;;  %v3179_v48 = vld [vmem:[%s5444_s3 + $0x4] sm:$0xf] }
 0x18c   : > { %v1014_v42 = vsel %vm1011_vm6, %v1013_v20, %v1009_v59  ;;  %v998_v40 = vor.u32 1.1754944e-38, %v997_v56  ;;  %v967_v18 = vand.u32 2147483648, %v4517_v6  ;;  %1696 = vmatpush.bf16.msra.mxu1 %v2748_v57  ;;  %v2716_v27 = vor.u32 %v3195_v15, %v2713_v24  ;;  %v3191_v56 = vld [vmem:[%s5444_s3 + $0x5c] sm:$0xf0]  ;;  %v2649_v61 = vld [vmem:[%s5444_s3 + $0x20] sm:$0xf0] }
 0x18d   : > { %1256 = vmatpush.msrb.mxu2 %v1220_v16  ;;  %v1029_v50 = vsel %vm1026_vm11, %v1028_v11, %v1024_v21  ;;  %1683 = vmatpush.bf16.msra.mxu3 %v2744_v43  ;;  %vm996_vm9 = vcmp.eq.f32.partialorder %v995_v9, 8.507059e+37  ;;  %v979_v55 = vsel %vm4844_vm2, %v4548_v5, %v975_v28  ;;  %vm961_vm7 = vweird.f32 %v4517_v6  ;;  %v2647_v37 = vld [vmem:[%s5444_s3] sm:$0xf]  ;;  %v3240_v16 = vld [vmem:[%s5444_s3 + $0x1e4] sm:$0xf0] }
 0x18e   : > { %v1216_v3 = vmul.f32 %v1029_v50, %v4498_v45  ;;  %v999_v14 = vsel %vm996_vm9, %v998_v40, %v994_v2  ;;  %v5648_v45 = vand.u32 2147483648, %v4521_v35  ;;  %vm4872_vm8 = vmor %vm961_vm7, %vm962_vm15  ;;  %v1215_v6 = vmul.f32 %v1014_v42, %v4493_v13  ;;  %v3183_v13 = vld [vmem:[%s5444_s3 + $0x1c] sm:$0xf0]  ;;  %v2881_v31 = vld [vmem:[%s5444_s3 + $0x1e8] sm:$0xf0] }
 0x18f   : > { %1257 = vmatpush.msrb.mxu2 %v1219_v23  ;;  %v5651_v5 = vand.u32 2147483647, %v4521_v35  ;;  %v964_v9 = vsel %vm4872_vm8, %v4543_v41, %v960_v1  ;;  %v2680_v46 = vor.u32 %v3191_v56, %v2679_v62  ;;  %vm966_vm10 = vcmp.eq.f32.partialorder %v965_v44, 8.507059e+37  ;;  %v2879_v41 = vld [vmem:[%s5444_s3 + $0x1c8] sm:$0xf] }
 0x190   : > { %v983_v32 = vor.u32 1.1754944e-38, %v5648_v45  ;;  %v968_v39 = vor.u32 1.1754944e-38, %v967_v18  ;;  %1697 = vmatpush.bf16.msra.mxu1 %v2716_v27  ;;  %v2684_v33 = vor.u32 %v3187_v63, %v2681_v51  ;;  %v1214_v35 = vmul.f32 %v999_v14, %v4488_v0  ;;  %v3236_v0 = vld [vmem:[%s5444_s3 + $0x1cc] sm:$0xf]  ;;  %v3232_v23 = vld [vmem:[%s5444_s3 + $0x1a4] sm:$0xf0] }
 0x191   : > { %1258 = vmatpush.msrb.mxu2 %v1218_v30  ;;  %vm981_vm12 = vcmp.eq.f32.partialorder %v5651_v5, 8.507059e+37  ;;  %1684 = vmatpush.bf16.msra.mxu3 %v2712_v47  ;;  %v2648_v60 = vor.u32 %v3183_v13, %v2647_v37  ;;  %v2652_v12 = vor.u32 %v3179_v48, %v2649_v61  ;;  %v2880_v53 = vor.u32 %v3240_v16, %v2879_v41  ;;  %v3228_v43 = vld [vmem:[%s5444_s3 + $0x18c] sm:$0xf]  ;;  %v3233_v11 = vld [vmem:[%s5444_s3 + $0x1ac] sm:$0xf0] }
 0x192   : > { %v984_v22 = vsel %vm981_vm12, %v983_v32, %v979_v55  ;;  %v969_v58 = vsel %vm966_vm10, %v968_v39, %v964_v9  ;;  %v2884_v17 = vor.u32 %v3236_v0, %v2881_v31  ;;  %v2888_v21 = vor.u32 %v3241_v36, %v2887_v29  ;;  %v2849_v8 = vld [vmem:[%s5444_s3 + $0x1a8] sm:$0xf0]  ;;  %v2815_v57 = vld [vmem:[%s5444_s3 + $0x148] sm:$0xf]  ;;  %v2823_v24 = vld [vmem:[%s5444_s3 + $0x150] sm:$0xf] }
 0x193   : > { %1259 = vmatpush.msrb.mxu2 %v1217_v10  ;;  %v1213_v54 = vmul.f32 %v984_v22, %v4483_v34  ;;  %v1212_v38 = vmul.f32 %v969_v58, %v4477_v49  ;;  %v2847_v34 = vld [vmem:[%s5444_s3 + $0x188] sm:$0xf]  ;;  %v2855_v49 = vld [vmem:[%s5444_s3 + $0x190] sm:$0xf]  ;;  %v2852_v19 = vor.u32 %v3228_v43, %v2849_v8  ;;  %v3220_v59 = vld [vmem:[%s5444_s3 + $0x14c] sm:$0xf] }
 0x194   : > { %1698 = vmatpush.bf16.msra.mxu1 %v2684_v33  ;;  %v2848_v28 = vor.u32 %v3232_v23, %v2847_v34  ;;  %v3224_v25 = vld [vmem:[%s5444_s3 + $0x164] sm:$0xf0]  ;;  %v2856_v30 = vor.u32 %v3233_v11, %v2855_v49  ;;  %v2817_v15 = vld [vmem:[%s5444_s3 + $0x168] sm:$0xf0]  ;;  %v3225_v50 = vld [vmem:[%s5444_s3 + $0x16c] sm:$0xf0] }
 0x195   : > { %1260 = vmatpush.msrb.mxu2 %v1216_v3  ;;  %1685 = vmatpush.bf16.msra.mxu3 %v2680_v46  ;;  %v2816_v20 = vor.u32 %v3224_v25, %v2815_v57  ;;  %v2820_v26 = vor.u32 %v3220_v59, %v2817_v15  ;;  %v2783_v1 = vld [vmem:[%s5444_s3 + $0x108] sm:$0xf]  ;;  %v2824_v10 = vor.u32 %v3225_v50, %v2823_v24  ;;  %v3585_v55 = vmov 0.0   ;;  %v3212_v14 = vld [vmem:[%s5444_s3 + $0x10c] sm:$0xf] }
 0x196   : > { %v3216_v44 = vld [vmem:[%s5444_s3 + $0x124] sm:$0xf0]  ;;  %309 = vst [vmem:[#allocation2] sm:$0x1] %v3585_v55  ;;  %v2785_v32 = vld [vmem:[%s5444_s3 + $0x128] sm:$0xf0] }
 0x197   : > { %1261 = vmatpush.msrb.mxu2 %v1215_v6  ;;  %v2784_v2 = vor.u32 %v3216_v44, %v2783_v1  ;;  %v2751_v47 = vld [vmem:[%s5444_s3 + $0xc8] sm:$0xf]  ;;  %v3217_v6 = vld [vmem:[%s5444_s3 + $0x12c] sm:$0xf0]  ;;  %v2788_v5 = vor.u32 %v3212_v14, %v2785_v32  ;;  %v3237_v46 = vld [vmem:[%s5444_s3 + $0x1d4] sm:$0xf] }
 0x198   : > { %1699 = vmatpush.bf16.msra.mxu1 %v2652_v12  ;;  %v3208_v42 = vld [vmem:[%s5444_s3 + $0xe4] sm:$0xf0]  ;;  %v2792_v9 = vor.u32 %v3217_v6, %v2791_v7  ;;  %v2889_v22 = vld [vmem:[%s5444_s3 + $0x1f0] sm:$0xf0]  ;;  %v3204_v39 = vld [vmem:[%s5444_s3 + $0xcc] sm:$0xf] }
 0x199   : > { %1262 = vmatpush.msrb.mxu2 %v1214_v35  ;;  %1686 = vmatpush.bf16.msra.mxu3 %v2648_v60  ;;  %v2752_v40 = vor.u32 %v3208_v42, %v2751_v47  ;;  %v2719_v4 = vld [vmem:[%s5444_s3 + $0x88] sm:$0xf]  ;;  %v2892_v33 = vor.u32 %v3237_v46, %v2889_v22  ;;  %v2753_v37 = vld [vmem:[%s5444_s3 + $0xe8] sm:$0xf0]  ;;  %v2759_v13 = vld [vmem:[%s5444_s3 + $0xd0] sm:$0xf] }
 0x19a   : > { %v3200_v18 = vld [vmem:[%s5444_s3 + $0xa4] sm:$0xf0]  ;;  %v3209_v35 = vld [vmem:[%s5444_s3 + $0xec] sm:$0xf0]  ;;  %v2756_v41 = vor.u32 %v3204_v39, %v2753_v37  ;;  %v3229_v61 = vld [vmem:[%s5444_s3 + $0x194] sm:$0xf] }
 0x19b   : > { %1263 = vmatpush.msrb.mxu2 %v1213_v54  ;;  %v2720_v27 = vor.u32 %v3200_v18, %v2719_v4  ;;  %v2687_v62 = vld [vmem:[%s5444_s3 + $0x48] sm:$0xf]  ;;  %v2760_v48 = vor.u32 %v3209_v35, %v2759_v13  ;;  %v2857_v58 = vld [vmem:[%s5444_s3 + $0x1b0] sm:$0xf0]  ;;  %v3196_v16 = vld [vmem:[%s5444_s3 + $0x8c] sm:$0xf] }
 0x19c   : > { %1731 = vmatpush.bf16.msrb.mxu1 %v2888_v21  ;;  %v3192_v56 = vld [vmem:[%s5444_s3 + $0x64] sm:$0xf0]  ;;  %v2860_v0 = vor.u32 %v3229_v61, %v2857_v58  ;;  %v2721_v31 = vld [vmem:[%s5444_s3 + $0xa8] sm:$0xf0]  ;;  %v2727_v54 = vld [vmem:[%s5444_s3 + $0x90] sm:$0xf] }
 0x19d   : > { %1264 = vmatpush.msrb.mxu2 %v1212_v38  ;;  %1718 = vmatpush.bf16.msrb.mxu3 %v2884_v17  ;;  %v2688_v3 = vor.u32 %v3192_v56, %v2687_v62  ;;  %v2655_v63 = vld [vmem:[%s5444_s3 + $0x8] sm:$0xf]  ;;  %v3201_v60 = vld [vmem:[%s5444_s3 + $0xac] sm:$0xf0]  ;;  %v3221_v29 = vld [vmem:[%s5444_s3 + $0x154] sm:$0xf]  ;;  %v2724_v12 = vor.u32 %v3196_v16, %v2721_v31 }
 0x19e   : > { %1265 = vmatmul.f32.vlgmr.msrb.gmra.mxu2 %v5652_v52  ;;  %v3184_v51 = vld [vmem:[%s5444_s3 + $0x24] sm:$0xf0]  ;;  %v2825_v36 = vld [vmem:[%s5444_s3 + $0x170] sm:$0xf0]  ;;  %v2728_v38 = vor.u32 %v3201_v60, %v2727_v54  ;;  %v2689_v17 = vld [vmem:[%s5444_s3 + $0x68] sm:$0xf0] }
 0x19f   : > { %1705 = vmatpush.bf16.msra.mxu2 %v2880_v53  ;;  %v2656_v45 = vor.u32 %v3184_v51, %v2655_v63  ;;  %v3188_v53 = vld [vmem:[%s5444_s3 + $0x4c] sm:$0xf]  ;;  %v2828_v34 = vor.u32 %v3221_v29, %v2825_v36  ;;  %v2695_v23 = vld [vmem:[%s5444_s3 + $0x50] sm:$0xf]  ;;  %v3213_v43 = vld [vmem:[%s5444_s3 + $0x114] sm:$0xf] }
 0x1a0   : > { %1732 = vmatpush.bf16.msrb.mxu1 %v2856_v30  ;;  %v3193_v21 = vld [vmem:[%s5444_s3 + $0x6c] sm:$0xf0]  ;;  %v2793_v8 = vld [vmem:[%s5444_s3 + $0x130] sm:$0xf0]  ;;  %v2692_v49 = vor.u32 %v3188_v53, %v2689_v17  ;;  %v2657_v57 = vld [vmem:[%s5444_s3 + $0x28] sm:$0xf0] }
 0x1a1   : > { %1719 = vmatpush.bf16.msrb.mxu3 %v2852_v19  ;;  %v2696_v11 = vor.u32 %v3193_v21, %v2695_v23  ;;  %v2796_v52 = vor.u32 %v3213_v43, %v2793_v8  ;;  %v2663_v19 = vld [vmem:[%s5444_s3 + $0x10] sm:$0xf]  ;;  %v3205_v30 = vld [vmem:[%s5444_s3 + $0xd4] sm:$0xf]  ;;  %v1228_v4 = vld [vmem:[#allocation2] sm:$0x1] }
 0x1a2   : > { %v3185_v25 = vld [vmem:[%s5444_s3 + $0x2c] sm:$0xf0]  ;;  %v2761_v59 = vld [vmem:[%s5444_s3 + $0xf0] sm:$0xf0]  ;;  %v3242_v55 = vld [vmem:[%s5444_s3 + $0x1f4] sm:$0xf0] }
 0x1a3   : > { %1706 = vmatpush.bf16.msra.mxu2 %v2848_v28  ;;  %v3180_v28 = vld [vmem:[%s5444_s3 + $0xc] sm:$0xf]  ;;  %v2664_v24 = vor.u32 %v3185_v25, %v2663_v19  ;;  %v2764_v50 = vor.u32 %v3205_v30, %v2761_v59  ;;  %v3189_v44 = vld [vmem:[%s5444_s3 + $0x54] sm:$0xf]  ;;  %v3238_v51 = vld [vmem:[%s5444_s3 + $0x1dc] sm:$0xf] }
 0x1a4   : > { %1733 = vmatpush.bf16.msrb.mxu1 %v2824_v10  ;;  %v2660_v15 = vor.u32 %v3180_v28, %v2657_v57  ;;  %v2697_v10 = vld [vmem:[%s5444_s3 + $0x70] sm:$0xf0]  ;;  %v2897_v14 = vld [vmem:[%s5444_s3 + $0x1f8] sm:$0xf0]  ;;  %v2831_v37 = vld [vmem:[%s5444_s3 + $0x158] sm:$0xf] }
 0x1a5   : > { %1720 = vmatpush.bf16.msrb.mxu3 %v2820_v26  ;;  %v2729_v26 = vld [vmem:[%s5444_s3 + $0xb0] sm:$0xf0]  ;;  %v2700_v47 = vor.u32 %v3189_v44, %v2697_v10  ;;  %v2900_v6 = vor.u32 %v3238_v51, %v2897_v14  ;;  %v3230_v46 = vld [vmem:[%s5444_s3 + $0x19c] sm:$0xf]  ;;  %v3226_v13 = vld [vmem:[%s5444_s3 + $0x174] sm:$0xf0] }
 0x1a6   : > { %v3181_v42 = vld [vmem:[%s5444_s3 + $0x14] sm:$0xf]  ;;  %v2865_v22 = vld [vmem:[%s5444_s3 + $0x1b8] sm:$0xf0]  ;;  %v2832_v61 = vor.u32 %v3226_v13, %v2831_v37  ;;  %v2799_v16 = vld [vmem:[%s5444_s3 + $0x118] sm:$0xf] }
 0x1a7   : > { %1707 = vmatpush.bf16.msra.mxu2 %v2816_v20  ;;  %v3197_v20 = vld [vmem:[%s5444_s3 + $0x94] sm:$0xf]  ;;  %v3250_v35 = vld [vmem:[%s5446_s5 + $0x38] sm:$0xff]  ;;  %v3248_v53 = vld [vmem:[%s5446_s5 + $0x28] sm:$0xff] }
 0x1a8   : > { %1734 = vmatpush.bf16.msrb.mxu1 %v2792_v9  ;;  %v2732_v1 = vor.u32 %v3197_v20, %v2729_v26  ;;  %v3234_v9 = vld [vmem:[%s5444_s3 + $0x1b4] sm:$0xf0]  ;;  %v3249_v31 = vld [vmem:[%s5446_s5 + $0x30] sm:$0xff]  ;;  %v3214_v54 = vld [vmem:[%s5444_s3 + $0x11c] sm:$0xf] }
 0x1a9   : > { %1721 = vmatpush.bf16.msrb.mxu3 %v2788_v5  ;;  %v2863_v5 = vld [vmem:[%s5444_s3 + $0x198] sm:$0xf]  ;;  %v2801_v60 = vld [vmem:[%s5444_s3 + $0x138] sm:$0xf0]  ;;  %v3255_v51 = vld [vmem:[%s5446_s5 + $0x60] sm:$0xff] }
 0x1aa   : > { %v2864_v39 = vor.u32 %v3234_v9, %v2863_v5  ;;  %v2804_v36 = vor.u32 %v3214_v54, %v2801_v60  ;;  %v2769_v17 = vld [vmem:[%s5444_s3 + $0xf8] sm:$0xf0]  ;;  %v2735_v43 = vld [vmem:[%s5444_s3 + $0x98] sm:$0xf]  ;;  %v3263_v14 = vld [vmem:[%s5446_s5 + $0xa0] sm:$0xff] }
 0x1ab   : > { %1708 = vmatpush.bf16.msra.mxu2 %v2784_v2  ;;  %v3202_v8 = vld [vmem:[%s5444_s3 + $0xb4] sm:$0xf0]  ;;  %v3190_v59 = vld [vmem:[%s5444_s3 + $0x5c] sm:$0xf]  ;;  %v3253_v5 = vld [vmem:[%s5446_s5 + $0x50] sm:$0xff] }
 0x1ac   : > { %1735 = vmatpush.bf16.msrb.mxu1 %v2760_v48  ;;  %v2833_v48 = vld [vmem:[%s5444_s3 + $0x178] sm:$0xf0]  ;;  %v2736_v28 = vor.u32 %v3202_v8, %v2735_v43  ;;  %v2703_v19 = vld [vmem:[%s5444_s3 + $0x58] sm:$0xf]  ;;  %v3261_v9 = vld [vmem:[%s5446_s5 + $0x90] sm:$0xff] }
 0x1ad   : > { %1722 = vmatpush.bf16.msrb.mxu3 %v2756_v41  ;;  %v3222_v41 = vld [vmem:[%s5444_s3 + $0x15c] sm:$0xf]  ;;  %v3194_v25 = vld [vmem:[%s5444_s3 + $0x74] sm:$0xf0]  ;;  %v3259_v37 = vld [vmem:[%s5446_s5 + $0x80] sm:$0xff] }
 0x1ae   : > { %v2836_v58 = vor.u32 %v3222_v41, %v2833_v48  ;;  %v3246_v30 = vld [vmem:[%s5446_s5 + $0x18] sm:$0xff]  ;;  %v3280_v41 = vld [vmem:[%s5446_s5 + $0x128] sm:$0xff]  ;;  %v3279_v48 = vld [vmem:[%s5446_s5 + $0x120] sm:$0xff] }
 0x1af   : > { %1709 = vmatpush.bf16.msra.mxu2 %v2752_v40  ;;  %v2665_v40 = vld [vmem:[%s5444_s3 + $0x30] sm:$0xf0]  ;;  %v2671_v20 = vld [vmem:[%s5444_s3 + $0x18] sm:$0xf]  ;;  %v3182_v44 = vld [vmem:[%s5444_s3 + $0x1c] sm:$0xf] }
 0x1b0   : > { %1736 = vmatpush.bf16.msrb.mxu1 %v2728_v38  ;;  %v2668_v62 = vor.u32 %v3181_v42, %v2665_v40  ;;  %v3210_v38 = vld [vmem:[%s5444_s3 + $0xf4] sm:$0xf0]  ;;  %v2673_v10 = vld [vmem:[%s5444_s3 + $0x38] sm:$0xf0]  ;;  %v3269_v54 = vld [vmem:[%s5446_s5 + $0xd0] sm:$0xff] }
 0x1b1   : > { %1723 = vmatpush.bf16.msrb.mxu3 %v2724_v12  ;;  %v2767_v12 = vld [vmem:[%s5444_s3 + $0xd8] sm:$0xf]  ;;  %v3288_v60 = vld [vmem:[%s5446_s5 + $0x168] sm:$0xff]  ;;  %v3283_v43 = vld [vmem:[%s5446_s5 + $0x140] sm:$0xff] }
 0x1b2   : > { %v2768_v23 = vor.u32 %v3210_v38, %v2767_v12  ;;  %v3186_v26 = vld [vmem:[%s5444_s3 + $0x34] sm:$0xf0]  ;;  %v3287_v12 = vld [vmem:[%s5446_s5 + $0x160] sm:$0xff] }
 0x1b3   : > { %1710 = vmatpush.bf16.msra.mxu2 %v2720_v27  ;;  %v3258_v42 = vld [vmem:[%s5446_s5 + $0x78] sm:$0xff]  ;;  %v3267_v38 = vld [vmem:[%s5446_s5 + $0xc0] sm:$0xff] }
 0x1b4   : > { %1737 = vmatpush.bf16.msrb.mxu1 %v2696_v11  ;;  %v3198_v11 = vld [vmem:[%s5444_s3 + $0x9c] sm:$0xf] }
 0x1b5   : > { %1724 = vmatpush.bf16.msrb.mxu3 %v2692_v49  ;;  %v3247_v49 = vld [vmem:[%s5446_s5 + $0x20] sm:$0xff]  ;;  %v3266_v40 = vld [vmem:[%s5446_s5 + $0xb8] sm:$0xff] }
 0x1b6   : > { %v3290_v13 = vld [vmem:[%s5446_s5 + $0x178] sm:$0xff] }
 0x1b7   : > { %1711 = vmatpush.bf16.msra.mxu2 %v2688_v3  ;;  %v2895_v3 = vld [vmem:[%s5444_s3 + $0x1d8] sm:$0xf] }
 0x1b8   : > { %1738 = vmatpush.bf16.msrb.mxu1 %v2664_v24  ;;  %v2896_v32 = vor.u32 %v3242_v55, %v2895_v3  ;;  %v2704_v24 = vor.u32 %v3194_v25, %v2703_v19  ;;  %v3256_v3 = vld [vmem:[%s5446_s5 + $0x68] sm:$0xff] }
 0x1b9   : > { %1725 = vmatpush.bf16.msrb.mxu3 %v2660_v15  ;;  %v2705_v15 = vld [vmem:[%s5444_s3 + $0x78] sm:$0xf0]  ;;  %v3264_v55 = vld [vmem:[%s5446_s5 + $0xa8] sm:$0xff] }
 0x1bb   : > { %1712 = vmatpush.bf16.msra.mxu2 %v2656_v45 }
 0x1bf   : > { %1744 = vmatpush.bf16.msrb.mxu2 %v2892_v33  ;;  %v2868_v33 = vor.u32 %v3230_v46, %v2865_v22  ;;  %v3252_v46 = vld [vmem:[%s5446_s5 + $0x48] sm:$0xff] }
 0x1c0   : > { %v3260_v22 = vld [vmem:[%s5446_s5 + $0x88] sm:$0xff] }
 0x1c3   : > { %1745 = vmatpush.bf16.msrb.mxu2 %v2860_v0  ;;  %v3218_v0 = vld [vmem:[%s5444_s3 + $0x134] sm:$0xf0] }
 0x1c4   : > { %v2800_v29 = vor.u32 %v3218_v0, %v2799_v16  ;;  %v3270_v16 = vld [vmem:[%s5446_s5 + $0xd8] sm:$0xff]  ;;  %v3289_v0 = vld [vmem:[%s5446_s5 + $0x170] sm:$0xff] }
 0x1c7   : > { %1746 = vmatpush.bf16.msrb.mxu2 %v2828_v34  ;;  %v3206_v34 = vld [vmem:[%s5444_s3 + $0xdc] sm:$0xf] }
 0x1c8   : > { %v2772_v21 = vor.u32 %v3206_v34, %v2769_v17  ;;  %v3285_v34 = vld [vmem:[%s5446_s5 + $0x150] sm:$0xff]  ;;  %v5337_v17 = vld [vmem:[%s5445_s4] sm:$0xff] }
 0x1cb   : > { %1747 = vmatpush.bf16.msrb.mxu2 %v2796_v52  ;;  %v2737_v52 = vld [vmem:[%s5444_s3 + $0xb8] sm:$0xf0] }
 0x1cc   : > { %v2740_v57 = vor.u32 %v3198_v11, %v2737_v52  ;;  %v1663_v52 = vperm.slane %v5337_v17, 0 }
 0x1cf   : > { %1748 = vmatpush.bf16.msrb.mxu2 %v2764_v50  ;;  %v2708_v50 = vor.u32 %v3190_v59, %v2705_v15 }
 0x1d3   : > { %1749 = vmatpush.bf16.msrb.mxu2 %v2732_v1  ;;  %v3245_v1 = vld [vmem:[%s5446_s5 + $0x10] sm:$0xff] }
 0x1d7   : > { %1750 = vmatpush.bf16.msrb.mxu2 %v2700_v47  ;;  %v2676_v47 = vor.u32 %v3182_v44, %v2673_v10 }
 0x1db   : > { %1751 = vmatpush.bf16.msrb.mxu2 %v2668_v62  ;;  %v3243_v62 = vld [vmem:[%s5446_s5] sm:$0xff] }
 0x1f4   : > { %v1246_v2 = vpop.f32.mrf.mxu1 }
 0x221   : > { %v1266_v18 = vpop.f32.mrf.mxu2 }
 0x222   : > { %v1267_v27 = vadd.f32 %v1266_v18, %v1246_v2  ;;  %v2672_v2 = vor.u32 %v3186_v26, %v2671_v20  ;;  %v3257_v18 = vld [vmem:[%s5446_s5 + $0x70] sm:$0xff] }
 0x224   : > { %v1269_v56 = vadd.f32 %v1267_v27, %v1228_v4  ;;  %v3244_v4 = vld [vmem:[%s5446_s5 + $0x8] sm:$0xff]  ;;  %v3265_v27 = vld [vmem:[%s5446_s5 + $0xb0] sm:$0xff] }
 0x226   : > { %1270 = vst [vmem:[#allocation2] sm:$0x1] %v1269_v56  ;;  %v3274_v56 = vld [vmem:[%s5446_s5 + $0xf8] sm:$0xff] }
 0x22d   : > { %v1274_v63 = vld [vmem:[#allocation2] sm:$0x1] }
 0x22e   : > { %v1275_v45 = vmul.f32 0.00390625, %v1274_v63  ;;  %v3273_v63 = vld [vmem:[%s5446_s5 + $0xf0] sm:$0xff] }
 0x230   : > { %v5102_v7 = vpack.c.bf16 %v1275_v45, %v1275_v45  ;;  %v3272_v45 = vld [vmem:[%s5446_s5 + $0xe8] sm:$0xff] }
 0x232   : > { %1687 = vmatmul.bf16.vlgmr.msra.gmra.mxu3 %v5102_v7  ;;  %1700 = vmatmul.bf16.vlgmr.msra.gmra.mxu1 %v5102_v7 }
 0x233   : > { %1713 = vmatmul.bf16.vlgmr.msra.gmra.mxu2 %v5102_v7  ;;  %1757 = vmatpush.bf16.msra.mxu3 %v2896_v32  ;;  %v3254_v32 = vld [vmem:[%s5446_s5 + $0x58] sm:$0xff] }
 0x234   : > { %1770 = vmatpush.bf16.msra.mxu1 %v2900_v6  ;;  %2312 = vmatpush.bf16.msra.mxu2 %v3250_v35  ;;  %v3271_v6 = vld [vmem:[%s5446_s5 + $0xe0] sm:$0xff]  ;;  %v3281_v35 = vld [vmem:[%s5446_s5 + $0x130] sm:$0xff] }
 0x237   : > { %1758 = vmatpush.bf16.msra.mxu3 %v2864_v39  ;;  %v3251_v39 = vld [vmem:[%s5446_s5 + $0x40] sm:$0xff] }
 0x238   : > { %1771 = vmatpush.bf16.msra.mxu1 %v2868_v33  ;;  %2313 = vmatpush.bf16.msra.mxu2 %v3249_v31  ;;  %v3282_v33 = vld [vmem:[%s5446_s5 + $0x138] sm:$0xff]  ;;  %v3276_v31 = vld [vmem:[%s5446_s5 + $0x108] sm:$0xff] }
 0x23b   : > { %1759 = vmatpush.bf16.msra.mxu3 %v2832_v61  ;;  %v3278_v61 = vld [vmem:[%s5446_s5 + $0x118] sm:$0xff] }
 0x23c   : > { %1772 = vmatpush.bf16.msra.mxu1 %v2836_v58  ;;  %2314 = vmatpush.bf16.msra.mxu2 %v3248_v53  ;;  %v3277_v58 = vld [vmem:[%s5446_s5 + $0x110] sm:$0xff]  ;;  %v3286_v53 = vld [vmem:[%s5446_s5 + $0x158] sm:$0xff] }
 0x23f   : > { %1760 = vmatpush.bf16.msra.mxu3 %v2800_v29  ;;  %v3275_v29 = vld [vmem:[%s5446_s5 + $0x100] sm:$0xff] }
 0x240   : > { %1773 = vmatpush.bf16.msra.mxu1 %v2804_v36  ;;  %2315 = vmatpush.bf16.msra.mxu2 %v3247_v49  ;;  %v3268_v36 = vld [vmem:[%s5446_s5 + $0xc8] sm:$0xff] }
 0x242   : > { %1726 = vmatmul.bf16.vlgmr.msrb.gmra.mxu3 %v5102_v7  ;;  %1739 = vmatmul.bf16.vlgmr.msrb.gmra.mxu1 %v5102_v7 }
 0x243   : > { %1752 = vmatmul.bf16.vlgmr.msrb.gmra.mxu2 %v5102_v7  ;;  %1761 = vmatpush.bf16.msra.mxu3 %v2768_v23  ;;  %v3284_v23 = vld [vmem:[%s5446_s5 + $0x148] sm:$0xff] }
 0x244   : > { %1774 = vmatpush.bf16.msra.mxu1 %v2772_v21  ;;  %2316 = vmatpush.bf16.msra.mxu2 %v3246_v30  ;;  %v1664_v21 = vperm.slane %v5337_v17, 1 }
 0x247   : > { %1762 = vmatpush.bf16.msra.mxu3 %v2736_v28  ;;  %v1665_v28 = vperm.slane %v5337_v17, 2 }
 0x248   : > { %1775 = vmatpush.bf16.msra.mxu1 %v2740_v57  ;;  %2317 = vmatpush.bf16.msra.mxu2 %v3245_v1  ;;  %v3306_v57 = vld [vmem:[%s5446_s5 + $0x1f8] sm:$0xff] }
 0x249   : > { %v3298_v1 = vld [vmem:[%s5446_s5 + $0x1b8] sm:$0xff] }
 0x24b   : > { %1763 = vmatpush.bf16.msra.mxu3 %v2704_v24 }
 0x24c   : > { %1776 = vmatpush.bf16.msra.mxu1 %v2708_v50  ;;  %2318 = vmatpush.bf16.msra.mxu2 %v3244_v4  ;;  %v3305_v50 = vld [vmem:[%s5446_s5 + $0x1f0] sm:$0xff] }
 0x24f   : > { %1764 = vmatpush.bf16.msra.mxu3 %v2672_v2  ;;  %v3304_v2 = vld [vmem:[%s5446_s5 + $0x1e8] sm:$0xff] }
 0x250   : > { %1777 = vmatpush.bf16.msra.mxu1 %v2676_v47  ;;  %2319 = vmatpush.bf16.msra.mxu2 %v3243_v62  ;;  %v1667_v47 = vperm.slane %v5337_v17, 4 }
 0x252   : > { %1765 = vmatmul.bf16.vlgmr.msra.gmra.mxu3 %v5102_v7 }
 0x253   : > { %2325 = vmatpush.bf16.msrb.mxu3 %v3258_v42  ;;  %1778 = vmatmul.bf16.vlgmr.msra.gmra.mxu1 %v5102_v7  ;;  %v3262_v7 = vld [vmem:[%s5446_s5 + $0x98] sm:$0xff] }
 0x254   : > { %2338 = vmatpush.bf16.msrb.mxu1 %v3266_v40  ;;  %2351 = vmatpush.bf16.msrb.mxu2 %v3274_v56  ;;  %v3297_v40 = vld [vmem:[%s5446_s5 + $0x1b0] sm:$0xff]  ;;  %v3296_v56 = vld [vmem:[%s5446_s5 + $0x1a8] sm:$0xff] }
 0x257   : > { %2326 = vmatpush.bf16.msrb.mxu3 %v3257_v18 }
 0x258   : > { %2339 = vmatpush.bf16.msrb.mxu1 %v3265_v27  ;;  %2352 = vmatpush.bf16.msrb.mxu2 %v3273_v63  ;;  %v3303_v27 = vld [vmem:[%s5446_s5 + $0x1e0] sm:$0xff]  ;;  %v1668_v63 = vperm.slane %v5337_v17, 5 }
 0x25b   : > { %2327 = vmatpush.bf16.msrb.mxu3 %v3256_v3 }
 0x25c   : > { %2340 = vmatpush.bf16.msrb.mxu1 %v3264_v55  ;;  %2353 = vmatpush.bf16.msrb.mxu2 %v3272_v45  ;;  %v1666_v55 = vperm.slane %v5337_v17, 3 }
 0x25f   : > { %2328 = vmatpush.bf16.msrb.mxu3 %v3255_v51  ;;  %v3302_v51 = vld [vmem:[%s5446_s5 + $0x1d8] sm:$0xff] }
 0x260   : > { %2341 = vmatpush.bf16.msrb.mxu1 %v3263_v14  ;;  %2354 = vmatpush.bf16.msrb.mxu2 %v3271_v6 }
 0x263   : > { %2329 = vmatpush.bf16.msrb.mxu3 %v3254_v32  ;;  %v3295_v32 = vld [vmem:[%s5446_s5 + $0x1a0] sm:$0xff] }
 0x264   : > { %2342 = vmatpush.bf16.msrb.mxu1 %v3262_v7  ;;  %2355 = vmatpush.bf16.msrb.mxu2 %v3270_v16  ;;  %v3299_v16 = vld [vmem:[%s5446_s5 + $0x1c0] sm:$0xff] }
 0x267   : > { %2330 = vmatpush.bf16.msrb.mxu3 %v3253_v5 }
 0x268   : > { %2343 = vmatpush.bf16.msrb.mxu1 %v3261_v9  ;;  %2356 = vmatpush.bf16.msrb.mxu2 %v3269_v54  ;;  %v3292_v54 = vld [vmem:[%s5446_s5 + $0x188] sm:$0xff] }
 0x26b   : > { %2331 = vmatpush.bf16.msrb.mxu3 %v3252_v46  ;;  %v3301_v46 = vld [vmem:[%s5446_s5 + $0x1d0] sm:$0xff] }
 0x26c   : > { %2344 = vmatpush.bf16.msrb.mxu1 %v3260_v22  ;;  %2357 = vmatpush.bf16.msrb.mxu2 %v3268_v36 }
 0x26f   : > { %2332 = vmatpush.bf16.msrb.mxu3 %v3251_v39 }
 0x270   : > { %2345 = vmatpush.bf16.msrb.mxu1 %v3259_v37  ;;  %2358 = vmatpush.bf16.msrb.mxu2 %v3267_v38  ;;  %v3291_v38 = vld [vmem:[%s5446_s5 + $0x180] sm:$0xff] }
 0x273   : > { %2364 = vmatpush.bf16.msra.mxu3 %v3282_v33  ;;  %v3294_v33 = vld [vmem:[%s5446_s5 + $0x198] sm:$0xff] }
 0x274   : > { %2377 = vmatpush.bf16.msra.mxu1 %v3290_v13 }
 0x277   : > { %2365 = vmatpush.bf16.msra.mxu3 %v3281_v35  ;;  %v3300_v35 = vld [vmem:[%s5446_s5 + $0x1c8] sm:$0xff] }
 0x278   : > { %2378 = vmatpush.bf16.msra.mxu1 %v3289_v0 }
 0x27b   : > { %2366 = vmatpush.bf16.msra.mxu3 %v3280_v41 }
 0x27c   : > { %2379 = vmatpush.bf16.msra.mxu1 %v3288_v60  ;;  %v1669_v60 = vperm.slane %v5337_v17, 6 }
 0x27f   : > { %2367 = vmatpush.bf16.msra.mxu3 %v3279_v48  ;;  %v1670_v48 = vperm.slane %v5337_v17, 7 }
 0x280   : > { %2380 = vmatpush.bf16.msra.mxu1 %v3287_v12 }
 0x283   : > { %2368 = vmatpush.bf16.msra.mxu3 %v3278_v61  ;;  %v3293_v61 = vld [vmem:[%s5446_s5 + $0x190] sm:$0xff] }
 0x284   : > { %2381 = vmatpush.bf16.msra.mxu1 %v3286_v53 }
 0x287   : > { %2369 = vmatpush.bf16.msra.mxu3 %v3277_v58 }
 0x288   : > { %2382 = vmatpush.bf16.msra.mxu1 %v3285_v34 }
 0x28b   : > { %2370 = vmatpush.bf16.msra.mxu3 %v3276_v31 }
 0x28c   : > { %2383 = vmatpush.bf16.msra.mxu1 %v3284_v23 }
 0x28f   : > { %2371 = vmatpush.bf16.msra.mxu3 %v3275_v29 }
 0x290   : > { %2384 = vmatpush.bf16.msra.mxu1 %v3283_v43 }
 0x2af   : > { %v1701_v8 = vpop.f32.mrf.mxu1 }
 0x2b0   : > { %v1702_v49 = vadd.f32 %v1701_v8, %v1664_v21 }
 0x2b2   : > { %v1784_v11 = vmax.f32 %v1702_v49, 0.0 }
 0x2b4   : > { %v1792_v19 = vpack.c.bf16 %v1784_v11, %v1784_v11 }
 0x2b5   : > { %v1688_v25 = vpop.f32.mrf.mxu3 }
 0x2b6   : > { %v1689_v30 = vadd.f32 %v1688_v25, %v1663_v52  ;;  %v1714_v59 = vpop.f32.mrf.mxu2  ;;  %2333 = vmatmul.bf16.vlgmr.msrb.gmra.mxu3 %v1792_v19 }
 0x2b7   : > { %v1715_v15 = vadd.f32 %v1714_v59, %v1665_v28  ;;  %v1703_v24 = vpop.f32.mrf.mxu1  ;;  %2403 = vmatpush.bf16.msrb.mxu3 %v3306_v57  ;;  %v1927_v57 = vld [vmem:[%s5447_s6] sm:$0x1] }
 0x2b8   : > { %v1783_v20 = vmax.f32 %v1689_v30, 0.0 }
 0x2b9   : > { %v1785_v26 = vmax.f32 %v1715_v15, 0.0 }
 0x2ba   : > { %v1791_v44 = vpack.c.bf16 %v1783_v20, %v1783_v20 }
 0x2bb   : > { %v1793_v10 = vpack.c.bf16 %v1785_v26, %v1785_v26  ;;  %2404 = vmatpush.bf16.msrb.mxu3 %v3305_v50 }
 0x2bc   : > { %2320 = vmatmul.bf16.vlgmr.msra.gmra.mxu2 %v1791_v44 }
 0x2bd   : > { %2346 = vmatmul.bf16.vlgmr.msrb.gmra.mxu1 %v1793_v10  ;;  %v1690_v42 = vpop.f32.mrf.mxu3  ;;  %2390 = vmatpush.bf16.msra.mxu2 %v3298_v1 }
 0x2be   : > { %v1716_v4 = vpop.f32.mrf.mxu2 }
 0x2bf   : > { %v1740_v18 = vpop.f32.mrf.mxu1  ;;  %2405 = vmatpush.bf16.msrb.mxu3 %v3304_v2 }
 0x2c0   : > { %v1741_v62 = vadd.f32 %v1740_v18, %v1667_v47 }
 0x2c1   : > { %2391 = vmatpush.bf16.msra.mxu2 %v3297_v40 }
 0x2c2   : > { %v1787_v3 = vmax.f32 %v1741_v62, 0.0 }
 0x2c3   : > { %2406 = vmatpush.bf16.msrb.mxu3 %v3303_v27 }
 0x2c4   : > { %v1795_v14 = vpack.c.bf16 %v1787_v3, %v1787_v3 }
 0x2c5   : > { %v1727_v45 = vpop.f32.mrf.mxu3  ;;  %2392 = vmatpush.bf16.msra.mxu2 %v3296_v56 }
 0x2c6   : > { %v1728_v7 = vadd.f32 %v1727_v45, %v1666_v55  ;;  %v1753_v6 = vpop.f32.mrf.mxu2  ;;  %2372 = vmatmul.bf16.vlgmr.msra.gmra.mxu3 %v1795_v14 }
 0x2c7   : > { %v1754_v5 = vadd.f32 %v1753_v6, %v1668_v63  ;;  %v1742_v9 = vpop.f32.mrf.mxu1  ;;  %2407 = vmatpush.bf16.msrb.mxu3 %v3302_v51 }
 0x2c8   : > { %v1786_v22 = vmax.f32 %v1728_v7, 0.0 }
 0x2c9   : > { %v1788_v39 = vmax.f32 %v1754_v5, 0.0  ;;  %2393 = vmatpush.bf16.msra.mxu2 %v3295_v32 }
 0x2ca   : > { %v1794_v37 = vpack.c.bf16 %v1786_v22, %v1786_v22 }
 0x2cb   : > { %v1796_v13 = vpack.c.bf16 %v1788_v39, %v1788_v39  ;;  %2408 = vmatpush.bf16.msrb.mxu3 %v3301_v46 }
 0x2cc   : > { %2359 = vmatmul.bf16.vlgmr.msrb.gmra.mxu2 %v1794_v37 }
 0x2cd   : > { %2385 = vmatmul.bf16.vlgmr.msra.gmra.mxu1 %v1796_v13  ;;  %v1729_v41 = vpop.f32.mrf.mxu3  ;;  %2394 = vmatpush.bf16.msra.mxu2 %v3294_v33 }
 0x2ce   : > { %v1755_v58 = vpop.f32.mrf.mxu2 }
 0x2cf   : > { %2409 = vmatpush.bf16.msrb.mxu3 %v3300_v35 }
 0x2d0   : > { %v1779_v0 = vpop.f32.mrf.mxu1 }
 0x2d1   : > { %v1780_v31 = vadd.f32 %v1779_v0, %v1670_v48  ;;  %2395 = vmatpush.bf16.msra.mxu2 %v3293_v61 }
 0x2d3   : > { %v1790_v29 = vmax.f32 %v1780_v31, 0.0  ;;  %2410 = vmatpush.bf16.msrb.mxu3 %v3299_v16 }
 0x2d5   : > { %v1798_v36 = vpack.c.bf16 %v1790_v29, %v1790_v29  ;;  %v1766_v12 = vpop.f32.mrf.mxu3  ;;  %2396 = vmatpush.bf16.msra.mxu2 %v3292_v54 }
 0x2d6   : > { %v1767_v53 = vadd.f32 %v1766_v12, %v1669_v60 }
 0x2d7   : > { %2411 = vmatmul.bf16.vlgmr.msrb.gmra.mxu3 %v1798_v36 }
 0x2d8   : > { %v1789_v34 = vmax.f32 %v1767_v53, 0.0  ;;  %v1781_v23 = vpop.f32.mrf.mxu1 }
 0x2d9   : > { %2397 = vmatpush.bf16.msra.mxu2 %v3291_v38 }
 0x2da   : > { %v1797_v21 = vpack.c.bf16 %v1789_v34, %v1789_v34 }
 0x2dc   : > { %2398 = vmatmul.bf16.vlgmr.msra.gmra.mxu2 %v1797_v21 }
 0x2dd   : > { %v1768_v43 = vpop.f32.mrf.mxu3 }
 0x339   : > { %v2334_v8 = vpop.f32.mrf.mxu3 }
 0x33a   : > { %v2347_v49 = vpop.f32.mrf.mxu1 }
 0x33f   : > { %v2321_v17 = vpop.f32.mrf.mxu2 }
 0x340   : > { %v2322_v30 = vadd.f32 %v2321_v17, %v1927_v57 }
 0x341   : > { %v2336_v11 = vpop.f32.mrf.mxu3 }
 0x342   : > { %v2349_v52 = vpop.f32.mrf.mxu1  ;;  %v2335_v15 = vadd.f32 %v2334_v8, %v2322_v30 }
 0x344   : > { %v2348_v20 = vadd.f32 %v2347_v49, %v2335_v15 }
 0x347   : > { %v2323_v28 = vpop.f32.mrf.mxu2 }
 0x349   : > { %v2373_v19 = vpop.f32.mrf.mxu3 }
 0x34a   : > { %v2386_v25 = vpop.f32.mrf.mxu1 }
 0x34f   : > { %v2360_v59 = vpop.f32.mrf.mxu2 }
 0x350   : > { %v2361_v26 = vadd.f32 %v2360_v59, %v2348_v20 }
 0x351   : > { %v2375_v24 = vpop.f32.mrf.mxu3 }
 0x352   : > { %v2388_v50 = vpop.f32.mrf.mxu1  ;;  %v2374_v44 = vadd.f32 %v2373_v19, %v2361_v26 }
 0x354   : > { %v2387_v2 = vadd.f32 %v2386_v25, %v2374_v44 }
 0x357   : > { %v2362_v1 = vpop.f32.mrf.mxu2 }
 0x35a   : > { %v2412_v10 = vpop.f32.mrf.mxu3 }
 0x35f   : > { %v2399_v47 = vpop.f32.mrf.mxu2 }
 0x360   : > { %v2400_v42 = vadd.f32 %v2399_v47, %v2387_v2 }
 0x362   : > { %v2413_v40 = vadd.f32 %v2412_v10, %v2400_v42  ;;  %v2414_v4 = vpop.f32.mrf.mxu3 }
 0x364   : > { %v3157_v18 = vmul.f32 -1.442695, %v2413_v40 }
 0x366   : > { %3499 = vpow2.f32 %v3157_v18 }
 0x367   : > { %v2401_v27 = vpop.f32.mrf.mxu2 }
 0x36c   : > { %v3500_v62 = vpop.eup %3499 }
 0x36d   : > { %v2419_v56 = vadd.f32 1.0, %v3500_v62 }
 0x36f   : > { %3501 = vrcp.f32 %v2419_v56  ;;  %v2431_v51 = vand.u32 2147483648, %v2419_v56  ;;  %v2429_v45 = vand.u32 2147483647, %v2419_v56  ;;  %vm2425_vm5 = vweird.f32 %v2419_v56 }
 0x371   : > { %v2432_v7 = vor.u32 1.1754944e-38, %v2431_v51  ;;  %vm2430_vm4 = vcmp.eq.f32.partialorder %v2429_v45, 8.507059e+37 }
 0x375   : > { %v3502_v3 = vpop.eup %3501 }
 0x376   : > { %v2421_v55 = vmul.f32 %v3502_v3, %v2419_v56  ;;  %vm2426_vm3 = vweird.f32 %v3502_v3 }
 0x377   : > { %vm2427_vm14 = vmor %vm2425_vm5, %vm2426_vm3 }
 0x378   : > { %v2422_v63 = vsub.f32 1.0, %v2421_v55 }
 0x37a   : > { %v2423_v14 = vmul.f32 %v3502_v3, %v2422_v63 }
 0x37c   : > { %v2424_v32 = vadd.f32 %v3502_v3, %v2423_v14 }
 0x37e   : > { %v2428_v6 = vsel %vm2427_vm14, %v3502_v3, %v2424_v32 }
 0x37f   : > { %v2433_v5 = vsel %vm2430_vm4, %v2432_v7, %v2428_v6 }
 0x380   : > { %2435 = vst [vmem:[%s293_s19] sm:$0x1] %v2433_v5 }
 0x381   : > { %3531 = shalt.err (!%p3528_p5)
}
 0x382   : > { %3313 = dma.vmem_to_hbm [thread:$0]  (%p3666_p4), %s2448_s20, 16, %s2450_s21, %s2437_s22  }
 0x383 PF: > { %p3319_p6 = scmp.ge.s32.totalorder %s3582_s29, 2  ;;  %s2461_s15 = sand.u32 1, %s3562_s24  }
 0x384   : > { %s2462_s17 = scalar_lea.sflag [#allocation4], %s2461_s15 }
 0x385   : > { %p3316_p7 = pnand %p3319_p6, %p3673_p8 }
 0x387   : > { %p3317_p9 = pneg %p3316_p7 }
 0x389   : > { %3557 = dma.done.wait (%p3317_p9), %s2462_s17, 16  }
 0x38a   : > { %3559 = vsyncadd (%p3317_p9), %s2462_s17, 4294967280  ;;  %s20_s29 = sadd.s32 1, %s3582_s29   ;;  %s5653_s24 = smov %s3566_s25 }
 0x38b   : > { %p17_p10 = scmp.ge.s32.totalorder %s20_s29, 4   ;;  %s5654_s25 = smov %s3570_s26 }
 0x38c   : > { %s5655_s26 = smov %s3679_s14  ;;  %s5656_s27 = smov %s3578_s28 }
 0x38d   : > { %s5657_s28 = smov %s5659_s9  ;;  %19 = sbr.rel (!%p17_p10) target bundleno = 4 (0x4), region = 91 }
 0x392   :  { %2467 = vsyncpa [#allocation4], 1 }
 0x393   :  { %2469 = vsyncpa [#allocation4 + $0x1], 1 }

</bundles_post_ra>
